<compile_context>
chip_gen: v7x
topology: tpu7x:2x2x1
jax: 0.10.0
libtpu: 0.0.40
codegen_flags: <defaults>
</compile_context>

<pallas_src>
import math
from functools import partial

import jax
import jax.numpy as jnp
from jax.experimental import pallas as pl
from jax.experimental.pallas import tpu as pltpu


def _mha_kernel(num_heads, head_dim, bt, seq_len,
                x_ref, wqkv_ref, bqkv_ref, wo_ref, bo_ref, o_ref):
    H = num_heads * head_dim
    M = bt * seq_len

    # (Bt, S, H) -> (Bt*S, H): leading-dim merge (free); one bf16 cast for MXU.
    x = x_ref[...].reshape(M, H).astype(jnp.bfloat16)

    # Fused Q|K|V projection: one (M, H) x (H, 3H) MXU pass, f32 accumulate.
    # 1/sqrt(head_dim) is already folded into the Q columns of wqkv/bqkv.
    qkv = jnp.dot(x, wqkv_ref[...],
                  preferred_element_type=jnp.float32) + bqkv_ref[0]

    def split_heads(base):
        # Columns [base, base+H) of the (M, 3H) slab -> (Bt*nh, S, hd) with
        # heads as a batch dim. Only static lane slices, a major-axis concat
        # and leading-dim reshapes (cheap, well-supported relayouts); the
        # attention contractions below are then single batched dot_generals.
        parts = [
            qkv[:, base + h * head_dim: base + (h + 1) * head_dim]
            .reshape(bt, 1, seq_len, head_dim)
            for h in range(num_heads)
        ]
        heads = jnp.concatenate(parts, axis=1)            # (Bt, nh, S, hd)
        return heads.reshape(bt * num_heads, seq_len, head_dim
                             ).astype(jnp.bfloat16)

    q = split_heads(0 * H)      # pre-scaled by 1/sqrt(head_dim) at init
    k = split_heads(1 * H)
    v = split_heads(2 * H)

    # scores = Q K^T: one batched MXU contraction over all (batch, head) pairs.
    scores = jnp.einsum('nqd,nkd->nqk', q, k,
                        preferred_element_type=jnp.float32)

    # Numerically stable softmax in f32 (v5e-safe); normalization deferred.
    m = jnp.max(scores, axis=-1, keepdims=True)
    p = jnp.exp(scores - m)
    denom = jnp.sum(p, axis=-1, keepdims=True)

    # PV: one batched contraction, then one (S, hd)-wide multiply by the EUP
    # reciprocal instead of S*S divides.
    o = jnp.einsum('nqk,nkd->nqd', p.astype(jnp.bfloat16), v,
                   preferred_element_type=jnp.float32)
    o = o * pl.reciprocal(denom, approx=True)

    # Merge heads back into a lane-contiguous (Bt*S, H) slab so the output
    # projection is a single K=H matmul (full MXU depth) instead of nh
    # K=head_dim accumulations.
    o = o.reshape(bt, num_heads, seq_len, head_dim)
    attn = jnp.concatenate(
        [o[:, h].reshape(M, head_dim) for h in range(num_heads)], axis=-1)

    out = jnp.dot(attn.astype(jnp.bfloat16), wo_ref[...],
                  preferred_element_type=jnp.float32) + bo_ref[0]
    # NOTE: at H < 128 this store is a masked (lane-padded) vst; benchmark and
    # tune at H >= 128 for meaningful numbers.
    o_ref[...] = out.reshape(bt, seq_len, H).astype(o_ref.dtype)


def _pick_batch_tile(B, S, H, num_heads, *, row_target=256,
                     act_vmem_budget=24 * 2 ** 20):
    """Batch elements per grid step: amortize per-step overhead and feed the
    MXU ~row_target rows, bounded by a rough f32 activation footprint."""
    per_b = 4 * (8 * S * H + 2 * num_heads * S * S)     # bytes, rough
    max_bt_vmem = max(1, act_vmem_budget // max(per_b, 1))
    bt = max(1, min(B, -(-row_target // S), max_bt_vmem))
    while B % bt:                                       # largest divisor of B
        bt -= 1
    # v7x has 2 TensorCores: prefer >= 2 parallel grid steps when splitting
    # does not starve the MXU of rows (no-op on 1-TC v5e/v6e).
    if B // bt < 2 <= B and bt % 2 == 0 and (bt // 2) * S >= 128:
        bt //= 2
    return bt


def prepare_params(params, num_heads):
    """One-time weight prep (call once, reuse across forwards): fuse Q|K|V
    into a single (H, 3H) bf16 weight, fold 1/sqrt(head_dim) into the Q
    columns/bias, cast the output projection to bf16. Biases stay f32."""
    H = params["wq"].shape[0]
    head_dim = H // num_heads
    scale = 1.0 / math.sqrt(head_dim)
    wqkv = jnp.concatenate(
        [params["wq"] * scale, params["wk"], params["wv"]], axis=1)
    bqkv = jnp.concatenate(
        [params["bq"] * scale, params["bk"], params["bv"]], axis=1)
    return {
        "wqkv": wqkv.astype(jnp.bfloat16),        # (H, 3H)
        "bqkv": bqkv.astype(jnp.float32),         # (1, 3H)
        "wo": params["wo"].astype(jnp.bfloat16),  # (H, H)
        "bo": params["bo"].astype(jnp.float32),   # (1, H)
    }


def multi_head_attention(x, fused, num_heads, *, batch_tile=None):
    """x: (B, S, H) f32. fused: output of prepare_params()."""
    B, S, H = x.shape
    assert H % num_heads == 0
    head_dim = H // num_heads
    nh = num_heads

    bt = batch_tile if batch_tile is not None else _pick_batch_tile(
        B, S, H, num_heads)
    assert B % bt == 0, "batch tile must divide batch"
    grid = (B // bt,)

    kernel = partial(_mha_kernel, num_heads, head_dim, bt, S)

    # Rough per-step VMEM need (f32 activations, bf16 weights; x/out blocks
    # double-buffered, weights single-buffered).
    step_bytes = (
        4 * bt * S * H * 4                       # x + out blocks, 2 bufs each
        + bt * S * 3 * H * 4                     # qkv intermediate
        + 3 * bt * nh * S * head_dim * 2         # q, k, v (bf16)
        + 2 * bt * nh * S * S * 4                # scores + p
        + 2 * bt * S * H * 4                     # o + merged attn slab
        + (3 * H * H + H * H) * 2                # fused weights (bf16)
        + 4 * H * 4                              # biases
    )
    vmem_limit = int(min(64 * 2 ** 20, max(32 * 2 ** 20, 2 * step_bytes)))

    flops = B * (2 * S * H * 3 * H        # fused QKV projection
                 + 4 * S * S * H          # QK^T + PV over all heads
                 + 2 * S * H * H)         # output projection
    bytes_accessed = int(x.size * 4 + fused["wqkv"].size * 2
                         + fused["bqkv"].size * 4 + fused["wo"].size * 2
                         + fused["bo"].size * 4 + B * S * H * 4)
    cost = pl.CostEstimate(flops=flops,
                           transcendentals=B * nh * S * S,
                           bytes_accessed=bytes_accessed)

    def build(single_buffer_weights):
        def const_spec(shape):
            imap = lambda b: (0,) * len(shape)
            if single_buffer_weights:
                try:
                    return pl.BlockSpec(shape, imap,
                                        pipeline_mode=pl.Buffered(1))
                except (AttributeError, TypeError):
                    pass
            return pl.BlockSpec(shape, imap)

        return pl.pallas_call(
            kernel,
            out_shape=jax.ShapeDtypeStruct((B, S, H), x.dtype),
            grid_spec=pltpu.PrefetchScalarGridSpec(
                num_scalar_prefetch=0,
                grid=grid,
                in_specs=[
                    pl.BlockSpec((bt, S, H), lambda b: (b, 0, 0)),   # x
                    const_spec((H, 3 * H)),                          # W_qkv
                    const_spec((1, 3 * H)),                          # b_qkv
                    const_spec((H, H)),                              # W_out
                    const_spec((1, H)),                              # b_out
                ],
                out_specs=pl.BlockSpec((bt, S, H), lambda b: (b, 0, 0)),
            ),
            compiler_params=pltpu.CompilerParams(
                dimension_semantics=("parallel",),
                vmem_limit_bytes=vmem_limit),
            cost_estimate=cost,
        )

    args = (x, fused["wqkv"], fused["bqkv"], fused["wo"], fused["bo"])
    try:
        # Grid-invariant weights single-buffered (halves weight VMEM; most
        # important on v7x's 64 MiB VMEM at large H).
        return build(single_buffer_weights=True)(*args)
    except Exception:
        # Fallback for Pallas builds without single-buffer pipeline_mode
        # support: default double-buffering (numerically identical).
        return build(single_buffer_weights=False)(*args)


def init_params(key, hidden_size):
    """Deterministic synthetic init (shapes match nn.Linear(H, H))."""
    keys = jax.random.split(key, 8)
    bound = 1.0 / math.sqrt(hidden_size)

    def w(k):
        # stored as (in, out) = torch_weight.T so the kernel does x @ W
        return jax.random.uniform(k, (hidden_size, hidden_size),
                                  jnp.float32, -bound, bound)

    def b(k):
        return jax.random.uniform(k, (1, hidden_size),
                                  jnp.float32, -bound, bound)

    return {
        "wq": w(keys[0]), "bq": b(keys[1]),
        "wk": w(keys[2]), "bk": b(keys[3]),
        "wv": w(keys[4]), "bv": b(keys[5]),
        "wo": w(keys[6]), "bo": b(keys[7]),
    }


def reference_mha(x, params, num_heads):
    """Pure-JAX f32 reference mirroring the PyTorch forward exactly."""
    B, S, H = x.shape
    hd = H // num_heads
    q = x @ params["wq"] + params["bq"][0]
    k = x @ params["wk"] + params["bk"][0]
    v = x @ params["wv"] + params["bv"][0]

    def split(t):  # (B, S, H) -> (B, nh, S, hd)
        return t.reshape(B, S, num_heads, hd).transpose(0, 2, 1, 3)

    q, k, v = split(q), split(k), split(v)
    scores = jnp.einsum("bhqd,bhkd->bhqk", q, k) / math.sqrt(hd)
    attn = jax.nn.softmax(scores, axis=-1)
    out = jnp.einsum("bhqk,bhkd->bhqd", attn, v)
    out = out.transpose(0, 2, 1, 3).reshape(B, S, H)
    return out @ params["wo"] + params["bo"][0]


if __name__ == "__main__":
    batch, seq_len, hidden_size, num_heads = 2, 8, 32, 4

    key = jax.random.PRNGKey(0)
    k_x, k_p = jax.random.split(key)
    x = jax.random.normal(k_x, (batch, seq_len, hidden_size), jnp.float32)
    params = init_params(k_p, hidden_size)

    # One-time weight fusion / scale fold / bf16 cast, outside the call path.
    fused = prepare_params(params, num_heads)

    out = multi_head_attention(x, fused, num_heads)
    out = jax.block_until_ready(out)

    ref = reference_mha(x, params, num_heads)
    assert out.shape == (batch, seq_len, hidden_size)
    # bf16 matmuls + approx reciprocal => looser tolerance than pure-f32 path.
    assert jnp.allclose(out, ref, atol=5e-2, rtol=5e-2), "mismatch vs reference"

    print("KERNEL_OK")
</pallas_src>

<mosaic_0001>
module attributes {stable_mosaic.version = 11 : i64} {
  func.func @_mha_kernel(%arg0: i32, %arg1: memref<2x8x32xf32, #tpu.memory_space<vmem>>, %arg2: memref<32x96xbf16, #tpu.memory_space<vmem>>, %arg3: memref<1x96xf32, #tpu.memory_space<vmem>>, %arg4: memref<32x32xbf16, #tpu.memory_space<vmem>>, %arg5: memref<1x32xf32, #tpu.memory_space<vmem>>, %arg6: memref<2x8x32xf32, #tpu.memory_space<vmem>>) attributes {dimension_semantics = [#tpu.dimension_semantics<parallel>], iteration_bounds = array<i64: 1>, scalar_prefetch = 0 : i64, scratch_operands = 0 : i64, tpu.core_type = #tpu.core_type<tc>, window_params = [{transform_indices = @transform_0, window_bounds = array<i64: 2, 8, 32>}, {pipeline_mode = #tpu.pipeline_mode<synchronous>, transform_indices = @transform_1, window_bounds = array<i64: 32, 96>}, {pipeline_mode = #tpu.pipeline_mode<synchronous>, transform_indices = @transform_2, window_bounds = array<i64: 1, 96>}, {pipeline_mode = #tpu.pipeline_mode<synchronous>, transform_indices = @transform_3, window_bounds = array<i64: 32, 32>}, {pipeline_mode = #tpu.pipeline_mode<synchronous>, transform_indices = @transform_4, window_bounds = array<i64: 1, 32>}, {transform_indices = @transform_5, window_bounds = array<i64: 2, 8, 32>}]} {
    %c0 = arith.constant 0 : index
    %c0_0 = arith.constant 0 : index
    %c0_1 = arith.constant 0 : index
    %0 = vector.load %arg1[%c0, %c0_0, %c0_1] : memref<2x8x32xf32, #tpu.memory_space<vmem>>, vector<2x8x32xf32>
    %1 = vector.shape_cast %0 : vector<2x8x32xf32> to vector<16x32xf32>
    %2 = arith.truncf %1 : vector<16x32xf32> to vector<16x32xbf16>
    %c0_2 = arith.constant 0 : index
    %c0_3 = arith.constant 0 : index
    %3 = vector.load %arg2[%c0_2, %c0_3] : memref<32x96xbf16, #tpu.memory_space<vmem>>, vector<32x96xbf16>
    %cst = arith.constant dense<0.000000e+00> : vector<16x96xf32>
    %4 = tpu.matmul %2, %3, %cst {dimension_numbers = #tpu.dot_dimension_numbers<[1], [0], [0], [1], [0, 0, 1, 1], [], []>} : vector<16x32xbf16>, vector<32x96xbf16>, vector<16x96xf32> -> vector<16x96xf32>
    %c0_4 = arith.constant 0 : index
    %c0_5 = arith.constant 0 : index
    %5 = vector.load %arg3[%c0_4, %c0_5] : memref<1x96xf32, #tpu.memory_space<vmem>>, vector<1x96xf32>
    %6 = vector.shape_cast %5 : vector<1x96xf32> to vector<96xf32>
    %7 = vector.shape_cast %6 : vector<96xf32> to vector<1x96xf32>
    %8 = vector.broadcast %7 : vector<1x96xf32> to vector<16x96xf32>
    %9 = arith.addf %4, %8 : vector<16x96xf32>
    %10 = vector.extract_strided_slice %9 {offsets = [0, 0], sizes = [16, 8], strides = [1, 1]} : vector<16x96xf32> to vector<16x8xf32>
    %11 = vector.shape_cast %10 : vector<16x8xf32> to vector<2x1x8x8xf32>
    %12 = vector.extract_strided_slice %9 {offsets = [0, 8], sizes = [16, 8], strides = [1, 1]} : vector<16x96xf32> to vector<16x8xf32>
    %13 = vector.shape_cast %12 : vector<16x8xf32> to vector<2x1x8x8xf32>
    %14 = vector.extract_strided_slice %9 {offsets = [0, 16], sizes = [16, 8], strides = [1, 1]} : vector<16x96xf32> to vector<16x8xf32>
    %15 = vector.shape_cast %14 : vector<16x8xf32> to vector<2x1x8x8xf32>
    %16 = vector.extract_strided_slice %9 {offsets = [0, 24], sizes = [16, 8], strides = [1, 1]} : vector<16x96xf32> to vector<16x8xf32>
    %17 = vector.shape_cast %16 : vector<16x8xf32> to vector<2x1x8x8xf32>
    %18 = tpu.concatenate %11, %13, %15, %17 in 1 : vector<2x1x8x8xf32>, vector<2x1x8x8xf32>, vector<2x1x8x8xf32>, vector<2x1x8x8xf32> -> vector<2x4x8x8xf32>
    %19 = vector.shape_cast %18 : vector<2x4x8x8xf32> to vector<8x8x8xf32>
    %20 = arith.truncf %19 : vector<8x8x8xf32> to vector<8x8x8xbf16>
    %21 = vector.extract_strided_slice %9 {offsets = [0, 32], sizes = [16, 8], strides = [1, 1]} : vector<16x96xf32> to vector<16x8xf32>
    %22 = vector.shape_cast %21 : vector<16x8xf32> to vector<2x1x8x8xf32>
    %23 = vector.extract_strided_slice %9 {offsets = [0, 40], sizes = [16, 8], strides = [1, 1]} : vector<16x96xf32> to vector<16x8xf32>
    %24 = vector.shape_cast %23 : vector<16x8xf32> to vector<2x1x8x8xf32>
    %25 = vector.extract_strided_slice %9 {offsets = [0, 48], sizes = [16, 8], strides = [1, 1]} : vector<16x96xf32> to vector<16x8xf32>
    %26 = vector.shape_cast %25 : vector<16x8xf32> to vector<2x1x8x8xf32>
    %27 = vector.extract_strided_slice %9 {offsets = [0, 56], sizes = [16, 8], strides = [1, 1]} : vector<16x96xf32> to vector<16x8xf32>
    %28 = vector.shape_cast %27 : vector<16x8xf32> to vector<2x1x8x8xf32>
    %29 = tpu.concatenate %22, %24, %26, %28 in 1 : vector<2x1x8x8xf32>, vector<2x1x8x8xf32>, vector<2x1x8x8xf32>, vector<2x1x8x8xf32> -> vector<2x4x8x8xf32>
    %30 = vector.shape_cast %29 : vector<2x4x8x8xf32> to vector<8x8x8xf32>
    %31 = arith.truncf %30 : vector<8x8x8xf32> to vector<8x8x8xbf16>
    %32 = vector.extract_strided_slice %9 {offsets = [0, 64], sizes = [16, 8], strides = [1, 1]} : vector<16x96xf32> to vector<16x8xf32>
    %33 = vector.shape_cast %32 : vector<16x8xf32> to vector<2x1x8x8xf32>
    %34 = vector.extract_strided_slice %9 {offsets = [0, 72], sizes = [16, 8], strides = [1, 1]} : vector<16x96xf32> to vector<16x8xf32>
    %35 = vector.shape_cast %34 : vector<16x8xf32> to vector<2x1x8x8xf32>
    %36 = vector.extract_strided_slice %9 {offsets = [0, 80], sizes = [16, 8], strides = [1, 1]} : vector<16x96xf32> to vector<16x8xf32>
    %37 = vector.shape_cast %36 : vector<16x8xf32> to vector<2x1x8x8xf32>
    %38 = vector.extract_strided_slice %9 {offsets = [0, 88], sizes = [16, 8], strides = [1, 1]} : vector<16x96xf32> to vector<16x8xf32>
    %39 = vector.shape_cast %38 : vector<16x8xf32> to vector<2x1x8x8xf32>
    %40 = tpu.concatenate %33, %35, %37, %39 in 1 : vector<2x1x8x8xf32>, vector<2x1x8x8xf32>, vector<2x1x8x8xf32>, vector<2x1x8x8xf32> -> vector<2x4x8x8xf32>
    %41 = vector.shape_cast %40 : vector<2x4x8x8xf32> to vector<8x8x8xf32>
    %42 = arith.truncf %41 : vector<8x8x8xf32> to vector<8x8x8xbf16>
    "tpu.trace_start"() <{level = 10 : i32, message = "nqd,nkd->nqk"}> : () -> ()
    %cst_6 = arith.constant dense<0.000000e+00> : vector<8x8x8xf32>
    %43 = tpu.matmul %20, %31, %cst_6 {dimension_numbers = #tpu.dot_dimension_numbers<[2], [2], [1], [1], [0, 0, 0, 1, 1, 1], [0], [0]>} : vector<8x8x8xbf16>, vector<8x8x8xbf16>, vector<8x8x8xf32> -> vector<8x8x8xf32>
    "tpu.trace_stop"() : () -> ()
    %cst_7 = arith.constant dense<0xFF800000> : vector<8x8xf32>
    %44 = vector.multi_reduction <maximumf>, %43, %cst_7 [2] : vector<8x8x8xf32> to vector<8x8xf32>
    %45 = vector.shape_cast %44 : vector<8x8xf32> to vector<8x8x1xf32>
    %46 = vector.broadcast %45 : vector<8x8x1xf32> to vector<8x8x8xf32>
    %47 = arith.subf %43, %46 : vector<8x8x8xf32>
    %48 = math.exp %47 : vector<8x8x8xf32>
    %cst_8 = arith.constant dense<0.000000e+00> : vector<8x8xf32>
    %49 = vector.multi_reduction <add>, %48, %cst_8 [2] : vector<8x8x8xf32> to vector<8x8xf32>
    %50 = vector.shape_cast %49 : vector<8x8xf32> to vector<8x8x1xf32>
    %51 = arith.truncf %48 : vector<8x8x8xf32> to vector<8x8x8xbf16>
    "tpu.trace_start"() <{level = 10 : i32, message = "nqk,nkd->nqd"}> : () -> ()
    %cst_9 = arith.constant dense<0.000000e+00> : vector<8x8x8xf32>
    %52 = tpu.matmul %51, %42, %cst_9 {dimension_numbers = #tpu.dot_dimension_numbers<[2], [1], [1], [2], [0, 0, 0, 1, 1, 2], [0], [0]>} : vector<8x8x8xbf16>, vector<8x8x8xbf16>, vector<8x8x8xf32> -> vector<8x8x8xf32>
    "tpu.trace_stop"() : () -> ()
    %53 = tpu.reciprocal %50 {approx = true} : vector<8x8x1xf32> -> vector<8x8x1xf32>
    %54 = vector.broadcast %53 : vector<8x8x1xf32> to vector<8x8x8xf32>
    %55 = arith.mulf %52, %54 : vector<8x8x8xf32>
    %56 = vector.shape_cast %55 : vector<8x8x8xf32> to vector<2x4x8x8xf32>
    %57 = vector.extract_strided_slice %56 {offsets = [0, 0, 0, 0], sizes = [2, 1, 8, 8], strides = [1, 1, 1, 1]} : vector<2x4x8x8xf32> to vector<2x1x8x8xf32>
    %58 = vector.shape_cast %57 : vector<2x1x8x8xf32> to vector<2x8x8xf32>
    %59 = vector.shape_cast %58 : vector<2x8x8xf32> to vector<16x8xf32>
    %60 = vector.extract_strided_slice %56 {offsets = [0, 1, 0, 0], sizes = [2, 1, 8, 8], strides = [1, 1, 1, 1]} : vector<2x4x8x8xf32> to vector<2x1x8x8xf32>
    %61 = vector.shape_cast %60 : vector<2x1x8x8xf32> to vector<2x8x8xf32>
    %62 = vector.shape_cast %61 : vector<2x8x8xf32> to vector<16x8xf32>
    %63 = vector.extract_strided_slice %56 {offsets = [0, 2, 0, 0], sizes = [2, 1, 8, 8], strides = [1, 1, 1, 1]} : vector<2x4x8x8xf32> to vector<2x1x8x8xf32>
    %64 = vector.shape_cast %63 : vector<2x1x8x8xf32> to vector<2x8x8xf32>
    %65 = vector.shape_cast %64 : vector<2x8x8xf32> to vector<16x8xf32>
    %66 = vector.extract_strided_slice %56 {offsets = [0, 3, 0, 0], sizes = [2, 1, 8, 8], strides = [1, 1, 1, 1]} : vector<2x4x8x8xf32> to vector<2x1x8x8xf32>
    %67 = vector.shape_cast %66 : vector<2x1x8x8xf32> to vector<2x8x8xf32>
    %68 = vector.shape_cast %67 : vector<2x8x8xf32> to vector<16x8xf32>
    %69 = tpu.concatenate %59, %62, %65, %68 in 1 : vector<16x8xf32>, vector<16x8xf32>, vector<16x8xf32>, vector<16x8xf32> -> vector<16x32xf32>
    %70 = arith.truncf %69 : vector<16x32xf32> to vector<16x32xbf16>
    %c0_10 = arith.constant 0 : index
    %c0_11 = arith.constant 0 : index
    %71 = vector.load %arg4[%c0_10, %c0_11] : memref<32x32xbf16, #tpu.memory_space<vmem>>, vector<32x32xbf16>
    %cst_12 = arith.constant dense<0.000000e+00> : vector<16x32xf32>
    %72 = tpu.matmul %70, %71, %cst_12 {dimension_numbers = #tpu.dot_dimension_numbers<[1], [0], [0], [1], [0, 0, 1, 1], [], []>} : vector<16x32xbf16>, vector<32x32xbf16>, vector<16x32xf32> -> vector<16x32xf32>
    %c0_13 = arith.constant 0 : index
    %c0_14 = arith.constant 0 : index
    %73 = vector.load %arg5[%c0_13, %c0_14] : memref<1x32xf32, #tpu.memory_space<vmem>>, vector<1x32xf32>
    %74 = vector.shape_cast %73 : vector<1x32xf32> to vector<32xf32>
    %75 = vector.shape_cast %74 : vector<32xf32> to vector<1x32xf32>
    %76 = vector.broadcast %75 : vector<1x32xf32> to vector<16x32xf32>
    %77 = arith.addf %72, %76 : vector<16x32xf32>
    %78 = vector.shape_cast %77 : vector<16x32xf32> to vector<2x8x32xf32>
    %c0_15 = arith.constant 0 : index
    %c0_16 = arith.constant 0 : index
    %c0_17 = arith.constant 0 : index
    %79 = vector.load %arg6[%c0_15, %c0_16, %c0_17] : memref<2x8x32xf32, #tpu.memory_space<vmem>>, vector<2x8x32xf32>
    tpu.vector_store %arg6[%c0_15, %c0_16, %c0_17], %78 {strides = array<i32>} : memref<2x8x32xf32, #tpu.memory_space<vmem>>, vector<2x8x32xf32>,
    return
  }
  func.func @transform_0(%arg0: i32) -> (i32, i32, i32) {
    %c0_i32 = arith.constant 0 : i32
    %c0_i32_0 = arith.constant 0 : i32
    %c0_i32_1 = arith.constant 0 : i32
    return %arg0, %c0_i32, %c0_i32_0 : i32, i32, i32
  }
  func.func @transform_1(%arg0: i32) -> (i32, i32) {
    %c0_i32 = arith.constant 0 : i32
    %c0_i32_0 = arith.constant 0 : i32
    %c0_i32_1 = arith.constant 0 : i32
    return %c0_i32, %c0_i32_0 : i32, i32
  }
  func.func @transform_2(%arg0: i32) -> (i32, i32) {
    %c0_i32 = arith.constant 0 : i32
    %c0_i32_0 = arith.constant 0 : i32
    %c0_i32_1 = arith.constant 0 : i32
    return %c0_i32, %c0_i32_0 : i32, i32
  }
  func.func @transform_3(%arg0: i32) -> (i32, i32) {
    %c0_i32 = arith.constant 0 : i32
    %c0_i32_0 = arith.constant 0 : i32
    %c0_i32_1 = arith.constant 0 : i32
    return %c0_i32, %c0_i32_0 : i32, i32
  }
  func.func @transform_4(%arg0: i32) -> (i32, i32) {
    %c0_i32 = arith.constant 0 : i32
    %c0_i32_0 = arith.constant 0 : i32
    %c0_i32_1 = arith.constant 0 : i32
    return %c0_i32, %c0_i32_0 : i32, i32
  }
  func.func @transform_5(%arg0: i32) -> (i32, i32, i32) {
    %c0_i32 = arith.constant 0 : i32
    %c0_i32_0 = arith.constant 0 : i32
    %c0_i32_1 = arith.constant 0 : i32
    return %arg0, %c0_i32, %c0_i32_0 : i32, i32, i32
  }
}

module attributes {stable_mosaic.version = 11 : i64} {
  func.func @_mha_kernel(%arg0: i32, %arg1: memref<2x8x32xf32, #tpu.memory_space<vmem>>, %arg2: memref<32x96xbf16, #tpu.memory_space<vmem>>, %arg3: memref<1x96xf32, #tpu.memory_space<vmem>>, %arg4: memref<32x32xbf16, #tpu.memory_space<vmem>>, %arg5: memref<1x32xf32, #tpu.memory_space<vmem>>, %arg6: memref<2x8x32xf32, #tpu.memory_space<vmem>>) attributes {dimension_semantics = [#tpu.dimension_semantics<parallel>], iteration_bounds = array<i64: 1>, scalar_prefetch = 0 : i64, scratch_operands = 0 : i64, tpu.core_type = #tpu.core_type<tc>, window_params = [{transform_indices = @transform_0, window_bounds = array<i64: 2, 8, 32>}, {pipeline_mode = #tpu.pipeline_mode<synchronous>, transform_indices = @transform_1, window_bounds = array<i64: 32, 96>}, {pipeline_mode = #tpu.pipeline_mode<synchronous>, transform_indices = @transform_2, window_bounds = array<i64: 1, 96>}, {pipeline_mode = #tpu.pipeline_mode<synchronous>, transform_indices = @transform_3, window_bounds = array<i64: 32, 32>}, {pipeline_mode = #tpu.pipeline_mode<synchronous>, transform_indices = @transform_4, window_bounds = array<i64: 1, 32>}, {transform_indices = @transform_5, window_bounds = array<i64: 2, 8, 32>}]} {
    %c0 = arith.constant 0 : index
    %c0_0 = arith.constant 0 : index
    %c0_1 = arith.constant 0 : index
    %0 = vector.load %arg1[%c0, %c0_0, %c0_1] : memref<2x8x32xf32, #tpu.memory_space<vmem>>, vector<2x8x32xf32>
    %1 = vector.shape_cast %0 : vector<2x8x32xf32> to vector<16x32xf32>
    %2 = arith.truncf %1 : vector<16x32xf32> to vector<16x32xbf16>
    %c0_2 = arith.constant 0 : index
    %c0_3 = arith.constant 0 : index
    %3 = vector.load %arg2[%c0_2, %c0_3] : memref<32x96xbf16, #tpu.memory_space<vmem>>, vector<32x96xbf16>
    %cst = arith.constant dense<0.000000e+00> : vector<16x96xf32>
    %4 = tpu.matmul %2, %3, %cst {dimension_numbers = #tpu.dot_dimension_numbers<[1], [0], [0], [1], [0, 0, 1, 1], [], []>} : vector<16x32xbf16>, vector<32x96xbf16>, vector<16x96xf32> -> vector<16x96xf32>
    %c0_4 = arith.constant 0 : index
    %c0_5 = arith.constant 0 : index
    %5 = vector.load %arg3[%c0_4, %c0_5] : memref<1x96xf32, #tpu.memory_space<vmem>>, vector<1x96xf32>
    %6 = vector.shape_cast %5 : vector<1x96xf32> to vector<96xf32>
    %7 = vector.shape_cast %6 : vector<96xf32> to vector<1x96xf32>
    %8 = vector.broadcast %7 : vector<1x96xf32> to vector<16x96xf32>
    %9 = arith.addf %4, %8 : vector<16x96xf32>
    %10 = vector.extract_strided_slice %9 {offsets = [0, 0], sizes = [16, 8], strides = [1, 1]} : vector<16x96xf32> to vector<16x8xf32>
    %11 = vector.shape_cast %10 : vector<16x8xf32> to vector<2x1x8x8xf32>
    %12 = vector.extract_strided_slice %9 {offsets = [0, 8], sizes = [16, 8], strides = [1, 1]} : vector<16x96xf32> to vector<16x8xf32>
    %13 = vector.shape_cast %12 : vector<16x8xf32> to vector<2x1x8x8xf32>
    %14 = vector.extract_strided_slice %9 {offsets = [0, 16], sizes = [16, 8], strides = [1, 1]} : vector<16x96xf32> to vector<16x8xf32>
    %15 = vector.shape_cast %14 : vector<16x8xf32> to vector<2x1x8x8xf32>
    %16 = vector.extract_strided_slice %9 {offsets = [0, 24], sizes = [16, 8], strides = [1, 1]} : vector<16x96xf32> to vector<16x8xf32>
    %17 = vector.shape_cast %16 : vector<16x8xf32> to vector<2x1x8x8xf32>
    %18 = tpu.concatenate %11, %13, %15, %17 in 1 : vector<2x1x8x8xf32>, vector<2x1x8x8xf32>, vector<2x1x8x8xf32>, vector<2x1x8x8xf32> -> vector<2x4x8x8xf32>
    %19 = vector.shape_cast %18 : vector<2x4x8x8xf32> to vector<8x8x8xf32>
    %20 = arith.truncf %19 : vector<8x8x8xf32> to vector<8x8x8xbf16>
    %21 = vector.extract_strided_slice %9 {offsets = [0, 32], sizes = [16, 8], strides = [1, 1]} : vector<16x96xf32> to vector<16x8xf32>
    %22 = vector.shape_cast %21 : vector<16x8xf32> to vector<2x1x8x8xf32>
    %23 = vector.extract_strided_slice %9 {offsets = [0, 40], sizes = [16, 8], strides = [1, 1]} : vector<16x96xf32> to vector<16x8xf32>
    %24 = vector.shape_cast %23 : vector<16x8xf32> to vector<2x1x8x8xf32>
    %25 = vector.extract_strided_slice %9 {offsets = [0, 48], sizes = [16, 8], strides = [1, 1]} : vector<16x96xf32> to vector<16x8xf32>
    %26 = vector.shape_cast %25 : vector<16x8xf32> to vector<2x1x8x8xf32>
    %27 = vector.extract_strided_slice %9 {offsets = [0, 56], sizes = [16, 8], strides = [1, 1]} : vector<16x96xf32> to vector<16x8xf32>
    %28 = vector.shape_cast %27 : vector<16x8xf32> to vector<2x1x8x8xf32>
    %29 = tpu.concatenate %22, %24, %26, %28 in 1 : vector<2x1x8x8xf32>, vector<2x1x8x8xf32>, vector<2x1x8x8xf32>, vector<2x1x8x8xf32> -> vector<2x4x8x8xf32>
    %30 = vector.shape_cast %29 : vector<2x4x8x8xf32> to vector<8x8x8xf32>
    %31 = arith.truncf %30 : vector<8x8x8xf32> to vector<8x8x8xbf16>
    %32 = vector.extract_strided_slice %9 {offsets = [0, 64], sizes = [16, 8], strides = [1, 1]} : vector<16x96xf32> to vector<16x8xf32>
    %33 = vector.shape_cast %32 : vector<16x8xf32> to vector<2x1x8x8xf32>
    %34 = vector.extract_strided_slice %9 {offsets = [0, 72], sizes = [16, 8], strides = [1, 1]} : vector<16x96xf32> to vector<16x8xf32>
    %35 = vector.shape_cast %34 : vector<16x8xf32> to vector<2x1x8x8xf32>
    %36 = vector.extract_strided_slice %9 {offsets = [0, 80], sizes = [16, 8], strides = [1, 1]} : vector<16x96xf32> to vector<16x8xf32>
    %37 = vector.shape_cast %36 : vector<16x8xf32> to vector<2x1x8x8xf32>
    %38 = vector.extract_strided_slice %9 {offsets = [0, 88], sizes = [16, 8], strides = [1, 1]} : vector<16x96xf32> to vector<16x8xf32>
    %39 = vector.shape_cast %38 : vector<16x8xf32> to vector<2x1x8x8xf32>
    %40 = tpu.concatenate %33, %35, %37, %39 in 1 : vector<2x1x8x8xf32>, vector<2x1x8x8xf32>, vector<2x1x8x8xf32>, vector<2x1x8x8xf32> -> vector<2x4x8x8xf32>
    %41 = vector.shape_cast %40 : vector<2x4x8x8xf32> to vector<8x8x8xf32>
    %42 = arith.truncf %41 : vector<8x8x8xf32> to vector<8x8x8xbf16>
    "tpu.trace_start"() <{level = 10 : i32, message = "nqd,nkd->nqk"}> : () -> ()
    %cst_6 = arith.constant dense<0.000000e+00> : vector<8x8x8xf32>
    %43 = tpu.matmul %20, %31, %cst_6 {dimension_numbers = #tpu.dot_dimension_numbers<[2], [2], [1], [1], [0, 0, 0, 1, 1, 1], [0], [0]>} : vector<8x8x8xbf16>, vector<8x8x8xbf16>, vector<8x8x8xf32> -> vector<8x8x8xf32>
    "tpu.trace_stop"() : () -> ()
    %cst_7 = arith.constant dense<0xFF800000> : vector<8x8xf32>
    %44 = vector.multi_reduction <maximumf>, %43, %cst_7 [2] : vector<8x8x8xf32> to vector<8x8xf32>
    %45 = vector.shape_cast %44 : vector<8x8xf32> to vector<8x8x1xf32>
    %46 = vector.broadcast %45 : vector<8x8x1xf32> to vector<8x8x8xf32>
    %47 = arith.subf %43, %46 : vector<8x8x8xf32>
    %48 = math.exp %47 : vector<8x8x8xf32>
    %cst_8 = arith.constant dense<0.000000e+00> : vector<8x8xf32>
    %49 = vector.multi_reduction <add>, %48, %cst_8 [2] : vector<8x8x8xf32> to vector<8x8xf32>
    %50 = vector.shape_cast %49 : vector<8x8xf32> to vector<8x8x1xf32>
    %51 = arith.truncf %48 : vector<8x8x8xf32> to vector<8x8x8xbf16>
    "tpu.trace_start"() <{level = 10 : i32, message = "nqk,nkd->nqd"}> : () -> ()
    %cst_9 = arith.constant dense<0.000000e+00> : vector<8x8x8xf32>
    %52 = tpu.matmul %51, %42, %cst_9 {dimension_numbers = #tpu.dot_dimension_numbers<[2], [1], [1], [2], [0, 0, 0, 1, 1, 2], [0], [0]>} : vector<8x8x8xbf16>, vector<8x8x8xbf16>, vector<8x8x8xf32> -> vector<8x8x8xf32>
    "tpu.trace_stop"() : () -> ()
    %53 = tpu.reciprocal %50 {approx = true} : vector<8x8x1xf32> -> vector<8x8x1xf32>
    %54 = vector.broadcast %53 : vector<8x8x1xf32> to vector<8x8x8xf32>
    %55 = arith.mulf %52, %54 : vector<8x8x8xf32>
    %56 = vector.shape_cast %55 : vector<8x8x8xf32> to vector<2x4x8x8xf32>
    %57 = vector.extract_strided_slice %56 {offsets = [0, 0, 0, 0], sizes = [2, 1, 8, 8], strides = [1, 1, 1, 1]} : vector<2x4x8x8xf32> to vector<2x1x8x8xf32>
    %58 = vector.shape_cast %57 : vector<2x1x8x8xf32> to vector<2x8x8xf32>
    %59 = vector.shape_cast %58 : vector<2x8x8xf32> to vector<16x8xf32>
    %60 = vector.extract_strided_slice %56 {offsets = [0, 1, 0, 0], sizes = [2, 1, 8, 8], strides = [1, 1, 1, 1]} : vector<2x4x8x8xf32> to vector<2x1x8x8xf32>
    %61 = vector.shape_cast %60 : vector<2x1x8x8xf32> to vector<2x8x8xf32>
    %62 = vector.shape_cast %61 : vector<2x8x8xf32> to vector<16x8xf32>
    %63 = vector.extract_strided_slice %56 {offsets = [0, 2, 0, 0], sizes = [2, 1, 8, 8], strides = [1, 1, 1, 1]} : vector<2x4x8x8xf32> to vector<2x1x8x8xf32>
    %64 = vector.shape_cast %63 : vector<2x1x8x8xf32> to vector<2x8x8xf32>
    %65 = vector.shape_cast %64 : vector<2x8x8xf32> to vector<16x8xf32>
    %66 = vector.extract_strided_slice %56 {offsets = [0, 3, 0, 0], sizes = [2, 1, 8, 8], strides = [1, 1, 1, 1]} : vector<2x4x8x8xf32> to vector<2x1x8x8xf32>
    %67 = vector.shape_cast %66 : vector<2x1x8x8xf32> to vector<2x8x8xf32>
    %68 = vector.shape_cast %67 : vector<2x8x8xf32> to vector<16x8xf32>
    %69 = tpu.concatenate %59, %62, %65, %68 in 1 : vector<16x8xf32>, vector<16x8xf32>, vector<16x8xf32>, vector<16x8xf32> -> vector<16x32xf32>
    %70 = arith.truncf %69 : vector<16x32xf32> to vector<16x32xbf16>
    %c0_10 = arith.constant 0 : index
    %c0_11 = arith.constant 0 : index
    %71 = vector.load %arg4[%c0_10, %c0_11] : memref<32x32xbf16, #tpu.memory_space<vmem>>, vector<32x32xbf16>
    %cst_12 = arith.constant dense<0.000000e+00> : vector<16x32xf32>
    %72 = tpu.matmul %70, %71, %cst_12 {dimension_numbers = #tpu.dot_dimension_numbers<[1], [0], [0], [1], [0, 0, 1, 1], [], []>} : vector<16x32xbf16>, vector<32x32xbf16>, vector<16x32xf32> -> vector<16x32xf32>
    %c0_13 = arith.constant 0 : index
    %c0_14 = arith.constant 0 : index
    %73 = vector.load %arg5[%c0_13, %c0_14] : memref<1x32xf32, #tpu.memory_space<vmem>>, vector<1x32xf32>
    %74 = vector.shape_cast %73 : vector<1x32xf32> to vector<32xf32>
    %75 = vector.shape_cast %74 : vector<32xf32> to vector<1x32xf32>
    %76 = vector.broadcast %75 : vector<1x32xf32> to vector<16x32xf32>
    %77 = arith.addf %72, %76 : vector<16x32xf32>
    %78 = vector.shape_cast %77 : vector<16x32xf32> to vector<2x8x32xf32>
    %c0_15 = arith.constant 0 : index
    %c0_16 = arith.constant 0 : index
    %c0_17 = arith.constant 0 : index
    %79 = vector.load %arg6[%c0_15, %c0_16, %c0_17] : memref<2x8x32xf32, #tpu.memory_space<vmem>>, vector<2x8x32xf32>
    tpu.vector_store %arg6[%c0_15, %c0_16, %c0_17], %78 {strides = array<i32>} : memref<2x8x32xf32, #tpu.memory_space<vmem>>, vector<2x8x32xf32>,
    return
  }
  func.func @transform_0(%arg0: i32) -> (i32, i32, i32) {
    %c0_i32 = arith.constant 0 : i32
    %c0_i32_0 = arith.constant 0 : i32
    %c0_i32_1 = arith.constant 0 : i32
    return %arg0, %c0_i32, %c0_i32_0 : i32, i32, i32
  }
  func.func @transform_1(%arg0: i32) -> (i32, i32) {
    %c0_i32 = arith.constant 0 : i32
    %c0_i32_0 = arith.constant 0 : i32
    %c0_i32_1 = arith.constant 0 : i32
    return %c0_i32, %c0_i32_0 : i32, i32
  }
  func.func @transform_2(%arg0: i32) -> (i32, i32) {
    %c0_i32 = arith.constant 0 : i32
    %c0_i32_0 = arith.constant 0 : i32
    %c0_i32_1 = arith.constant 0 : i32
    return %c0_i32, %c0_i32_0 : i32, i32
  }
  func.func @transform_3(%arg0: i32) -> (i32, i32) {
    %c0_i32 = arith.constant 0 : i32
    %c0_i32_0 = arith.constant 0 : i32
    %c0_i32_1 = arith.constant 0 : i32
    return %c0_i32, %c0_i32_0 : i32, i32
  }
  func.func @transform_4(%arg0: i32) -> (i32, i32) {
    %c0_i32 = arith.constant 0 : i32
    %c0_i32_0 = arith.constant 0 : i32
    %c0_i32_1 = arith.constant 0 : i32
    return %c0_i32, %c0_i32_0 : i32, i32
  }
  func.func @transform_5(%arg0: i32) -> (i32, i32, i32) {
    %c0_i32 = arith.constant 0 : i32
    %c0_i32_0 = arith.constant 0 : i32
    %c0_i32_1 = arith.constant 0 : i32
    return %arg0, %c0_i32, %c0_i32_0 : i32, i32, i32
  }
}

</mosaic_0001>

<bundles_post_ra>
// kernel: tpu_custom_call.1
= control target key start
LH: loop header
LB: loop body
LE: loop exit
PB: predicated region body
PF: predicated region fallthrough
CT: control target
= control target key end

     0   :  { %10 = vsyncpa [#allocation3], 0  ;;  %s1766_s0 = inlined_call_operand.hbm [shape: f32[2,8,32], index: 0, kind: input, shape index: {}]   ;;  %s1767_s1 = inlined_call_operand.hbm [shape: bf16[32,96], index: 1, kind: input, shape index: {}]   ;;  %s1768_s2 = inlined_call_operand.vmem [shape: f32[1,96], index: 2, kind: input, shape index: {}]   ;;  %s1769_s3 = inlined_call_operand.hbm [shape: bf16[32,32], index: 3, kind: input, shape index: {}]   ;;  %s1770_s4 = inlined_call_operand.vmem [shape: f32[1,32], index: 4, kind: input, shape index: {}]   ;;  %s1771_s5 = inlined_call_operand.hbm [shape: f32[2,8,32], index: 5, kind: output, shape index: {}]  }
   0x1   :  { %11 = vsyncpa [#allocation6], 0 }
   0x2   :  { %12 = vsyncpa [#allocation4], 0  ;;  %s1491_s18 = smov [#allocation5]   ;;  %s1397_s22 = scalar_lea.hbm %s1767_s1, 256 }
   0x3   :  { %s30_s19 = sshll.u32 %s1491_s18, 4  ;;  %p1398_p0 = scmp.ne.s32.totalorder %s1767_s1, %s1397_s22  ;;  %s31_s19 = int_to_ptr.vmem [resolvable:$true] %s30_s19 }
   0x4   :  { %p1401_p1 = scmp.lt.u32.totalorder %s1397_s22, %s1767_s1 }
   0x6   :  { %p1403_p2 = pnand %p1401_p1, %p1398_p0 }
   0x8   :  { %1406 = shalt.err (!%p1403_p2)
}
   0x9   :  { %s1407_s27 = scalar_lea.vmem %s31_s19, 256  ;;  %p1412_p4 = scmp.lt.s32.totalorder %s31_s19, %s31_s19 }
   0xa   :  { %p1408_p3 = scmp.ne.s32.totalorder %s31_s19, %s1407_s27  ;;  %p1413_p5 = scmp.lt.s32.totalorder %s1407_s27, %s1407_s27 }
   0xc   :  { %p1414_p6 = por %p1413_p5, %p1412_p4 }
   0xe   :  { %p1415_p7 = pnand %p1414_p6, %p1408_p3 }
  0x10   :  { %1418 = shalt.err (!%p1415_p7)
}
  0x11   :  { %s1492_s28 = smov 64   ;;  %s1493_s29 = smov 4  }
  0x12   :  { %36 = dma.hbm_to_vmem [thread:$0]  %s1767_s1, 256, %s31_s19, [#allocation6], %s1492_s28, %s1492_s28, %s1493_s29  }
  0x13   :  { %s1494_s7 = smov [#allocation2]   ;;  %s1419_s11 = scalar_lea.hbm %s1766_s0, 256 }
  0x14   :  { %s18_s8 = sshll.u32 %s1494_s7, 4  ;;  %p1420_p8 = scmp.ne.s32.totalorder %s1766_s0, %s1419_s11  ;;  %s19_s8 = int_to_ptr.vmem [resolvable:$true] %s18_s8 }
  0x15   :  { %p1423_p9 = scmp.lt.u32.totalorder %s1419_s11, %s1766_s0 }
  0x17   :  { %p1425_p10 = pnand %p1423_p9, %p1420_p8 }
  0x19   :  { %1428 = shalt.err (!%p1425_p10)
}
  0x1a   :  { %s1429_s16 = scalar_lea.vmem %s19_s8, 256  ;;  %p1434_p12 = scmp.lt.s32.totalorder %s19_s8, %s19_s8 }
  0x1b   :  { %p1430_p11 = scmp.ne.s32.totalorder %s19_s8, %s1429_s16  ;;  %p1435_p13 = scmp.lt.s32.totalorder %s1429_s16, %s1429_s16 }
  0x1d   :  { %p1436_p0 = por %p1435_p13, %p1434_p12 }
  0x1f   :  { %p1437_p1 = pnand %p1436_p0, %p1430_p11 }
  0x21   :  { %1440 = shalt.err (!%p1437_p1)
}
  0x22   :  { %s1495_s1 = smov 128   ;;  %s1496_s17 = smov 8  }
  0x23   :  { %24 = dma.hbm_to_vmem [thread:$0]  %s1766_s0, 256, %s19_s8, [#allocation3], %s1495_s1, %s1495_s1, %s1496_s17  }
  0x24   :  { %s1497_s20 = smov [#allocation7]   ;;  %s1441_s24 = scalar_lea.hbm %s1769_s3, 256 }
  0x25   :  { %s44_s21 = sshll.u32 %s1497_s20, 4  ;;  %p1442_p2 = scmp.ne.s32.totalorder %s1769_s3, %s1441_s24  ;;  %s45_s21 = int_to_ptr.vmem [resolvable:$true] %s44_s21 }
  0x26   :  { %p1445_p3 = scmp.lt.u32.totalorder %s1441_s24, %s1769_s3 }
  0x28   :  { %p1447_p4 = pnand %p1445_p3, %p1442_p2 }
  0x2a   :  { %1450 = shalt.err (!%p1447_p4)
}
  0x2b   :  { %s1451_s6 = scalar_lea.vmem %s45_s21, 256  ;;  %p1456_p6 = scmp.lt.s32.totalorder %s45_s21, %s45_s21 }
  0x2c   :  { %p1452_p5 = scmp.ne.s32.totalorder %s45_s21, %s1451_s6  ;;  %p1457_p7 = scmp.lt.s32.totalorder %s1451_s6, %s1451_s6 }
  0x2e   :  { %p1458_p8 = por %p1457_p7, %p1456_p6 }
  0x30   :  { %p1459_p9 = pnand %p1458_p8, %p1452_p5 }
  0x32   :  { %1462 = shalt.err (!%p1459_p9)
}
  0x33   :  { %50 = dma.hbm_to_vmem [thread:$0]  %s1769_s3, 256, %s45_s21, [#allocation6], %s1492_s28, %s1492_s28, %s1493_s29  }
  0x34   :  { %1485 = dma.done.wait [#allocation3], 256  }
  0x35   :  { %1486 = vsyncadd [#allocation3], 4294967040 }
  0x36   :  { %1487 = dma.done.wait [#allocation6], 512  }
  0x37   :  { %1488 = vsyncadd [#allocation6], 4294966784  ;;  %v1498_v0 = vmov 0.0   ;;  %vm1499_vm0 = vmmov 0   ;;  %v1361_v1 = vld [vmem:[#allocation5] sm:$0xff]   ;;  %v1362_v2 = vld [vmem:[#allocation5 + $0x8] sm:$0xff]  }
  0x38   :  { %1218 = vmatprep.subr.bf16.mxu0 %v1498_v0  ;;  %1222 = vmatprep.mubr.msk.bf16.mxu0 %vm1499_vm0, %v1498_v0  ;;  %v63_v3 = vld [vmem:[#allocation2] sm:$0xff]  ;;  %v64_v4 = vld [vmem:[#allocation2 + $0x8] sm:$0xff]  ;;  %vm89_vm1 = vcmask 261120   ;;  %s1500_s8 = smov 104   ;;  %s1501_s9 = smov 120   ;;  %vm165_vm2 = vcmask 64512  }
  0x39   :  { %1226 = vmatprep.subr.bf16.mxu1 %v1498_v0  ;;  %1228 = vmatprep.mubr.msk.bf16.mxu1 %vm1499_vm0, %v1498_v0  ;;  %v65_v5 = vpack.c.bf16 %v64_v4, %v63_v3  ;;  %v1156_v6 = vld [vmem:[%s1768_s2] ss:$0 sm:$0xff]  ;;  %s1502_s10 = smov 112   ;;  %s1503_s11 = smov 96   ;;  %vm640_vm3 = vcmask 1043456   ;;  %vm1062_vm4 = vcmask 130048  }
  0x3a   :  { %1219 = vmatpush3.bf16.msra.mxu0 %v1361_v1  ;;  %s1504_s2 = smov 16   ;;  %vm1065_vm5 = vcmask 195584   ;;  %s1506_s14 = smov [#allocation8]  }
  0x3b   :  { %1220 = vmatprep.subr.bf16.mxu0 %v1498_v0  ;;  %s1143_s15 = sshll.u32 %s1506_s14, 4  ;;  %s1144_s15 = int_to_ptr.vmem [resolvable:$true] %s1143_s15 }
  0x3c   :  { %s1463_s16 = scalar_lea.vmem %s1144_s15, 256  ;;  %p1468_p11 = scmp.lt.s32.totalorder %s1144_s15, %s1144_s15 }
  0x3d   :  { %p1464_p10 = scmp.ne.s32.totalorder %s1144_s15, %s1463_s16  ;;  %p1469_p12 = scmp.lt.s32.totalorder %s1463_s16, %s1463_s16 }
  0x3e   :  { %1221 = vmatpush3.bf16.msra.mxu0 %v1362_v2 }
  0x3f   :  { %1232 = vmatprep.subr.bf16.mxu0 %v1498_v0  ;;  %p1470_p13 = por %p1469_p12, %p1468_p11 }
  0x41   :  { %1223 = vmatmul.mubr.msk.bf16.vlgmr.msra.gmra.mrb[0].mxu0 %vm89_vm1, %v65_v5  ;;  %p1471_p0 = pnand %p1470_p13, %p1464_p10 }
  0x42   :  { %1234 = vmatprep.mubr.msk.bf16.mxu0 %vm1499_vm0, %v1498_v0 }
 0x114   :  { %v127_v7 = vpop.f32.mrb[0].mxu0 }
 0x115   :  { %v128_v8 = vadd.f32 %v1156_v6, %v127_v7  ;;  %v1224_v9 = vpop.f32.mrb[1].mxu0 }
 0x116   :  { %v130_v10 = vpop.f32.mrb[2].mxu0 }
 0x117   :  { %148 = vrot.lane.b32.xlu1 %v128_v8, %s1500_s8  ;;  %136 = vrot.lane.b32.xlu0 %v128_v8, %s1501_s9  ;;  %v1225_v11 = vpop.f32.mrb[3].mxu0  ;;  %v131_v12 = vadd.f32 %v1156_v6, %v130_v10  ;;  %v154_v13 = vpack.c.bf16 %v128_v8, %v128_v8 }
 0x119   :  { %v1598_v23 = vpack.c.bf16 %v131_v12, %v131_v12 }
 0x11b   :  { %142 = vrot.lane.b32.xlu0 %v128_v8, %s1502_s10  ;;  %138 = vrot.lane.b32.xlu1 %v131_v12, %s1501_s9 }
 0x11f   :  { %144 = vrot.lane.b32.xlu0 %v131_v12, %s1502_s10  ;;  %150 = vrot.lane.b32.xlu1 %v131_v12, %s1500_s8 }
 0x123   :  { %163 = vrot.lane.b32.xlu0 %v154_v13, %s1503_s11 }
 0x189   :  { %v149_v14 = vpop.permute.xlu1 %148  ;;  %v137_v15 = vpop.permute.xlu0 %136 }
 0x18a   :  { %v155_v16 = vpack.c.bf16 %v137_v15, %v137_v15  ;;  %v157_v19 = vpack.c.bf16 %v149_v14, %v149_v14 }
 0x18c   :  { %213 = vrot.lane.b32.xlu1 %v155_v16, %s1503_s11 }
 0x18d   :  { %v143_v17 = vpop.permute.xlu0 %142  ;;  %v139_v18 = vpop.permute.xlu1 %138 }
 0x18e   :  { %v156_v20 = vpack.c.bf16 %v143_v17, %v143_v17  ;;  %v1596_v22 = vpack.c.bf16 %v139_v18, %v139_v18 }
 0x190   :  { %262 = vrot.lane.b32.xlu0 %v156_v20, %s1503_s11  ;;  %311 = vrot.lane.b32.xlu1 %v157_v19, %s1503_s11 }
 0x191   :  { %v145_v21 = vpop.permute.xlu0 %144  ;;  %v151_v24 = vpop.permute.xlu1 %150 }
 0x192   :  { %v1602_v26 = vpack.c.bf16 %v145_v21, %v145_v21  ;;  %v1604_v27 = vpack.c.bf16 %v151_v24, %v151_v24 }
 0x194   :  { %409 = vrot.lane.b32.xlu1 %v1596_v22, %s1503_s11  ;;  %360 = vrot.lane.b32.xlu0 %v1598_v23, %s1503_s11 }
 0x195   :  { %v164_v25 = vpop.permute.xlu0 %163 }
 0x196   :  { %v170_v28 = vsel %vm165_vm2, %v164_v25, 0 }
 0x197   :  { %1227 = vmatpush3.bf16.xpose.msra.mxu1 %v170_v28 }
 0x198   :  { %507 = vrot.lane.b32.xlu1 %v1604_v27, %s1503_s11  ;;  %458 = vrot.lane.b32.xlu0 %v1602_v26, %s1503_s11 }
 0x199   :  { %1238 = vmatprep.subr.bf16.mxu1 %v1498_v0 }
 0x19c   :  { %635 = vrot.lane.b32.xlu1 %v154_v13, %s1492_s28  ;;  %684 = vrot.lane.b32.xlu0 %v155_v16, %s1492_s28 }
 0x19e   :  { %1229 = vmatmul.mubr.msk.bf16.vlgmr.msra.gmra.mrb[0].mxu1 %vm165_vm2, %v154_v13 }
 0x19f   :  { %1240 = vmatprep.mubr.msk.bf16.mxu1 %vm1499_vm0, %v1498_v0 }
 0x1a0   :  { %732 = vrot.lane.b32.xlu1 %v156_v20, %s1492_s28 }
 0x1a4   :  { %780 = vrot.lane.b32.xlu1 %v157_v19, %s1492_s28 }
 0x1fe   :  { %v214_v29 = vpop.permute.xlu1 %213 }
 0x1ff   :  { %v219_v30 = vsel %vm165_vm2, %v214_v29, 0 }
 0x200   :  { %1233 = vmatpush3.bf16.xpose.msra.mxu0 %v219_v30 }
 0x201   :  { %1244 = vmatprep.subr.bf16.mxu0 %v1498_v0 }
 0x202   :  { %v263_v31 = vpop.permute.xlu0 %262  ;;  %v312_v33 = vpop.permute.xlu1 %311 }
 0x203   :  { %v268_v32 = vsel %vm165_vm2, %v263_v31, 0  ;;  %v317_v34 = vsel %vm165_vm2, %v312_v33, 0 }
 0x204   :  { %1239 = vmatpush3.bf16.xpose.msra.mxu1 %v268_v32 }
 0x205   :  { %1250 = vmatprep.subr.bf16.mxu1 %v1498_v0 }
 0x206   :  { %v361_v35 = vpop.permute.xlu0 %360  ;;  %v410_v37 = vpop.permute.xlu1 %409 }
 0x207   :  { %1235 = vmatmul.mubr.msk.bf16.vlgmr.msra.gmra.mrb[4].mxu0 %vm165_vm2, %v155_v16  ;;  %v366_v36 = vsel %vm165_vm2, %v361_v35, 0  ;;  %v415_v38 = vsel %vm165_vm2, %v410_v37, 0 }
 0x208   :  { %1245 = vmatpush3.bf16.xpose.msra.mxu0 %v317_v34  ;;  %1246 = vmatprep.mubr.msk.bf16.mxu0 %vm1499_vm0, %v1498_v0 }
 0x209   :  { %1256 = vmatprep.subr.bf16.mxu0 %v1498_v0 }
 0x20a   :  { %v459_v39 = vpop.permute.xlu0 %458  ;;  %v508_v40 = vpop.permute.xlu1 %507 }
 0x20b   :  { %1241 = vmatmul.mubr.msk.bf16.vlgmr.msra.gmra.mrb[4].mxu1 %vm165_vm2, %v156_v20  ;;  %v464_v41 = vsel %vm165_vm2, %v459_v39, 0  ;;  %v513_v42 = vsel %vm165_vm2, %v508_v40, 0 }
 0x20c   :  { %1251 = vmatpush3.bf16.xpose.msra.mxu1 %v366_v36  ;;  %1252 = vmatprep.mubr.msk.bf16.mxu1 %vm1499_vm0, %v1498_v0 }
 0x20d   :  { %1262 = vmatprep.subr.bf16.mxu1 %v1498_v0 }
 0x20e   :  { %v636_v43 = vpop.permute.xlu1 %635  ;;  %v685_v45 = vpop.permute.xlu0 %684 }
 0x20f   :  { %1247 = vmatmul.mubr.msk.bf16.vlgmr.msra.gmra.mrb[8].mxu0 %vm165_vm2, %v157_v19  ;;  %v642_v44 = vsel %vm640_vm3, %v636_v43, 0  ;;  %v690_v46 = vsel %vm640_vm3, %v685_v45, 0 }
 0x210   :  { %1257 = vmatpush3.bf16.xpose.msra.mxu0 %v415_v38  ;;  %1258 = vmatprep.mubr.msk.bf16.mxu0 %vm1499_vm0, %v1498_v0 }
 0x211   :  { %1268 = vmatprep.subr.bf16.mxu0 %v1498_v0 }
 0x213   :  { %1253 = vmatmul.mubr.msk.bf16.vlgmr.msra.gmra.mrb[8].mxu1 %vm165_vm2, %v1598_v23 }
 0x214   :  { %1263 = vmatpush3.bf16.xpose.msra.mxu1 %v464_v41  ;;  %1264 = vmatprep.mubr.msk.bf16.mxu1 %vm1499_vm0, %v1498_v0 }
 0x215   :  { %1274 = vmatprep.subr.bf16.mxu1 %v1498_v0 }
 0x217   :  { %1259 = vmatmul.mubr.msk.bf16.vlgmr.msra.gmra.mrb[12].mxu0 %vm165_vm2, %v1596_v22 }
 0x218   :  { %1269 = vmatpush3.bf16.xpose.msra.mxu0 %v513_v42  ;;  %1270 = vmatprep.mubr.msk.bf16.mxu0 %vm1499_vm0, %v1498_v0 }
 0x219   :  { %1280 = vmatprep.subr.bf16.mxu0 %v1498_v0 }
 0x21b   :  { %1265 = vmatmul.mubr.msk.bf16.vlgmr.msra.gmra.mrb[12].mxu1 %vm165_vm2, %v1602_v26 }
 0x21c   :  { %1275 = vmatpush3.bf16.msra.mxu1 %v642_v44  ;;  %1276 = vmatprep.mubr.msk.bf16.mxu1 %vm1499_vm0, %v1498_v0 }
 0x21d   :  { %1286 = vmatprep.subr.bf16.mxu1 %v1498_v0 }
 0x21f   :  { %1271 = vmatmul.mubr.msk.bf16.vlgmr.msra.gmra.mrb[16].mxu0 %vm165_vm2, %v1604_v27 }
 0x220   :  { %1281 = vmatpush3.bf16.msra.mxu0 %v690_v46  ;;  %1282 = vmatprep.mubr.msk.bf16.mxu0 %vm1499_vm0, %v1498_v0 }
 0x221   :  { %1292 = vmatprep.subr.bf16.mxu0 %v1498_v0 }
 0x271   :  { %v206_v47 = vpop.f32.mrb[0].mxu1 }
 0x272   :  { %v1230_v48 = vpop.f32.mrb[1].mxu1  ;;  %v555_v49 = vsel %vm165_vm2, %v206_v47, -inf }
 0x273   :  { %v209_v50 = vpop.f32.mrb[2].mxu1  ;;  %556 = vmax.xlane.f32.xlu0 %v555_v49 }
 0x274   :  { %v1231_v51 = vpop.f32.mrb[3].mxu1 }
 0x2da   :  { %v255_v52 = vpop.f32.mrb[4].mxu0 }
 0x2db   :  { %v1236_v53 = vpop.f32.mrb[5].mxu0  ;;  %v558_v54 = vsel %vm165_vm2, %v255_v52, -inf }
 0x2dc   :  { %559 = vmax.xlane.f32.xlu1 %v558_v54  ;;  %v258_v55 = vpop.f32.mrb[6].mxu0 }
 0x2dd   :  { %v1237_v56 = vpop.f32.mrb[7].mxu0 }
 0x2de   :  { %v304_v57 = vpop.f32.mrb[4].mxu1 }
 0x2df   :  { %v1242_v58 = vpop.f32.mrb[5].mxu1  ;;  %v561_v59 = vsel %vm165_vm2, %v304_v57, -inf }
 0x2e0   :  { %v307_v60 = vpop.f32.mrb[6].mxu1  ;;  %562 = vmax.xlane.f32.xlu0 %v561_v59 }
 0x2e1   :  { %v1243_v61 = vpop.f32.mrb[7].mxu1 }
 0x2e2   :  { %v353_v62 = vpop.f32.mrb[8].mxu0 }
 0x2e3   :  { %v1248_v63 = vpop.f32.mrb[9].mxu0  ;;  %v564_v1 = vsel %vm165_vm2, %v353_v62, -inf }
 0x2e4   :  { %565 = vmax.xlane.f32.xlu0 %v564_v1  ;;  %v356_v2 = vpop.f32.mrb[10].mxu0 }
 0x2e5   :  { %v1249_v3 = vpop.f32.mrb[11].mxu0 }
 0x2e6   :  { %v1664_v4 = vpop.f32.mrb[8].mxu1 }
 0x2e7   :  { %v1254_v5 = vpop.f32.mrb[9].mxu1  ;;  %v567_v28 = vsel %vm165_vm2, %v1664_v4, -inf }
 0x2e8   :  { %v405_v6 = vpop.f32.mrb[10].mxu1 }
 0x2e9   :  { %v1255_v7 = vpop.f32.mrb[11].mxu1 }
 0x2ea   :  { %v1666_v8 = vpop.f32.mrb[12].mxu0 }
 0x2eb   :  { %v1260_v9 = vpop.f32.mrb[13].mxu0  ;;  %v570_v31 = vsel %vm165_vm2, %v1666_v8, -inf }
 0x2ec   :  { %v454_v10 = vpop.f32.mrb[14].mxu0 }
 0x2ed   :  { %876 = vrot.lane.b32.xlu1 %v1596_v22, %s1492_s28  ;;  %v1261_v11 = vpop.f32.mrb[15].mxu0  ;;  %v733_v22 = vpop.permute.xlu1 %732 }
 0x2ee   :  { %v1670_v12 = vpop.f32.mrb[12].mxu1  ;;  %v738_v30 = vsel %vm640_vm3, %v733_v22, 0 }
 0x2ef   :  { %v1266_v13 = vpop.f32.mrb[13].mxu1 }
 0x2f0   :  { %v503_v14 = vpop.f32.mrb[14].mxu1 }
 0x2f1   :  { %v1267_v15 = vpop.f32.mrb[15].mxu1  ;;  %v781_v33 = vpop.permute.xlu1 %780 }
 0x2f2   :  { %v1672_v16 = vpop.f32.mrb[16].mxu0 }
 0x2f3   :  { %v1272_v17 = vpop.f32.mrb[17].mxu0  ;;  %v576_v32 = vsel %vm165_vm2, %v1672_v16, -inf }
 0x2f4   :  { %v552_v18 = vpop.f32.mrb[18].mxu0 }
 0x2f5   :  { %v1273_v19 = vpop.f32.mrb[19].mxu0 }
 0x2fa   :  { %828 = vrot.lane.b32.xlu0 %v1598_v23, %s1492_s28  ;;  %v573_v23 = vsel %vm165_vm2, %v1670_v12, -inf }
 0x300   :  { %v557_v20 = vpop.xlane.xlu0 %556 }
 0x301   :  { %v579_v21 = vsub.f32 %v206_v47, %v557_v20 }
 0x303   :  { %v587_v24 = vmul.f32 1.442695, %v579_v21 }
 0x305   :  { %1365 = vpow2.f32 %v587_v24 }
 0x30f   :  { %v1676_v25 = vpop.eup %1365 }
 0x310   :  { %v627_v29 = vpack.c.bf16 %v1676_v25, %v1676_v25  ;;  %v603_v18 = vsel %vm165_vm2, %v1676_v25, 0.0 }
 0x311   :  { %568 = vmax.xlane.f32.xlu1 %v567_v28 }
 0x312   :  { %1277 = vmatmul.mubr.msk.bf16.vlgmr.msra.gmra.mrb[16].mxu1 %vm165_vm2, %v627_v29 }
 0x313   :  { %1287 = vmatpush3.bf16.msra.mxu1 %v738_v30  ;;  %1288 = vmatprep.mubr.msk.bf16.mxu1 %vm1499_vm0, %v1498_v0 }
 0x314   :  { %1298 = vmatprep.subr.bf16.mxu1 %v1498_v0 }
 0x315   :  { %574 = vmax.xlane.f32.xlu1 %v573_v23 }
 0x319   :  { %571 = vmax.xlane.f32.xlu0 %v570_v31 }
 0x31d   :  { %577 = vmax.xlane.f32.xlu0 %v576_v32 }
 0x326   :  { %972 = vrot.lane.b32.xlu1 %v1604_v27, %s1492_s28 }
 0x333   :  { %924 = vrot.lane.b32.xlu0 %v1602_v26, %s1492_s28  ;;  %v786_v26 = vsel %vm640_vm3, %v781_v33, 0  ;;  %s1505_s28 = smov 24  }
 0x369   :  { %v560_v34 = vpop.xlane.xlu1 %559 }
 0x36a   :  { %v580_v35 = vsub.f32 %v255_v52, %v560_v34 }
 0x36c   :  { %v589_v36 = vmul.f32 1.442695, %v580_v35 }
 0x36d   :  { %v563_v37 = vpop.xlane.xlu0 %562  ;;  %v877_v51 = vpop.permute.xlu1 %876 }
 0x36e   :  { %1367 = vpow2.f32 %v589_v36  ;;  %v581_v38 = vsub.f32 %v304_v57, %v563_v37  ;;  %v882_v53 = vsel %vm640_vm3, %v877_v51, 0 }
 0x370   :  { %v591_v39 = vmul.f32 1.442695, %v581_v38 }
 0x371   :  { %v566_v40 = vpop.xlane.xlu0 %565 }
 0x372   :  { %1369 = vpow2.f32 %v591_v39  ;;  %v582_v41 = vsub.f32 %v353_v62, %v566_v40 }
 0x374   :  { %v593_v42 = vmul.f32 1.442695, %v582_v41 }
 0x375   :  { %v829_v46 = vpop.permute.xlu0 %828 }
 0x376   :  { %1371 = vpow2.f32 %v593_v42  ;;  %v834_v49 = vsel %vm640_vm3, %v829_v46, 0 }
 0x378   :  { %v1368_v43 = vpop.eup %1367 }
 0x379   :  { %v606_v44 = vsel %vm165_vm2, %v1368_v43, 0.0  ;;  %v628_v27 = vpack.c.bf16 %v1368_v43, %v1368_v43 }
 0x37a   :  { %607 = vadd.xlane.f32.xlu0 %v606_v44 }
 0x37b   :  { %1283 = vmatmul.mubr.msk.bf16.vlgmr.msra.gmra.mrb[20].mxu0 %vm165_vm2, %v628_v27 }
 0x37c   :  { %v1370_v45 = vpop.eup %1369  ;;  %1293 = vmatpush3.bf16.msra.mxu0 %v786_v26  ;;  %1294 = vmatprep.mubr.msk.bf16.mxu0 %vm1499_vm0, %v1498_v0 }
 0x37d   :  { %v609_v47 = vsel %vm165_vm2, %v1370_v45, 0.0  ;;  %v629_v48 = vpack.c.bf16 %v1370_v45, %v1370_v45  ;;  %1304 = vmatprep.subr.bf16.mxu0 %v1498_v0  ;;  %v1363_v45 = vld [vmem:[#allocation7] sm:$0xff]  }
 0x37e   :  { %610 = vadd.xlane.f32.xlu0 %v609_v47 }
 0x37f   :  { %1289 = vmatmul.mubr.msk.bf16.vlgmr.msra.gmra.mrb[20].mxu1 %vm165_vm2, %v629_v48 }
 0x380   :  { %v1372_v50 = vpop.eup %1371  ;;  %1299 = vmatpush3.bf16.msra.mxu1 %v834_v49  ;;  %1300 = vmatprep.mubr.msk.bf16.mxu1 %vm1499_vm0, %v1498_v0 }
 0x381   :  { %v630_v52 = vpack.c.bf16 %v1372_v50, %v1372_v50  ;;  %1310 = vmatprep.subr.bf16.mxu1 %v1498_v0 }
 0x383   :  { %1295 = vmatmul.mubr.msk.bf16.vlgmr.msra.gmra.mrb[24].mxu0 %vm165_vm2, %v630_v52 }
 0x384   :  { %1305 = vmatpush3.bf16.msra.mxu0 %v882_v53  ;;  %1306 = vmatprep.mubr.msk.bf16.mxu0 %vm1499_vm0, %v1498_v0 }
 0x385   :  { %1316 = vmatprep.subr.bf16.mxu0 %v1498_v0 }
 0x39e   :  { %v569_v54 = vpop.xlane.xlu1 %568 }
 0x39f   :  { %v583_v55 = vsub.f32 %v1664_v4, %v569_v54 }
 0x3a1   :  { %v595_v56 = vmul.f32 1.442695, %v583_v55 }
 0x3a2   :  { %v575_v57 = vpop.xlane.xlu1 %574 }
 0x3a3   :  { %1373 = vpow2.f32 %v595_v56  ;;  %v585_v58 = vsub.f32 %v1670_v12, %v575_v57 }
 0x3a5   :  { %v599_v59 = vmul.f32 1.442695, %v585_v58 }
 0x3a6   :  { %v572_v60 = vpop.xlane.xlu0 %571  ;;  %v973_v10 = vpop.permute.xlu1 %972 }
 0x3a7   :  { %1375 = vpow2.f32 %v599_v59  ;;  %v584_v61 = vsub.f32 %v1666_v8, %v572_v60  ;;  %v978_v14 = vsel %vm640_vm3, %v973_v10, 0  ;;  %v1364_v60 = vld [vmem:[#allocation7 + $0x8] sm:$0xff]  }
 0x3a9   :  { %v597_v62 = vmul.f32 1.442695, %v584_v61 }
 0x3aa   :  { %v578_v63 = vpop.xlane.xlu0 %577 }
 0x3ab   :  { %1377 = vpow2.f32 %v597_v62  ;;  %v586_v1 = vsub.f32 %v1672_v16, %v578_v63  ;;  %v612_v16 = vsel %vm165_vm2, %v1372_v50, 0.0 }
 0x3ad   :  { %v1374_v2 = vpop.eup %1373  ;;  %v601_v3 = vmul.f32 1.442695, %v586_v1 }
 0x3ae   :  { %v925_v5 = vpop.permute.xlu0 %924  ;;  %v631_v6 = vpack.c.bf16 %v1374_v2, %v1374_v2  ;;  %v615_v19 = vsel %vm165_vm2, %v1374_v2, 0.0 }
 0x3af   :  { %1379 = vpow2.f32 %v601_v3  ;;  %v930_v4 = vsel %vm640_vm3, %v925_v5, 0 }
 0x3b0   :  { %1301 = vmatmul.mubr.msk.bf16.vlgmr.msra.gmra.mrb[24].mxu1 %vm165_vm2, %v631_v6 }
 0x3b1   :  { %v1376_v7 = vpop.eup %1375  ;;  %1311 = vmatpush3.bf16.msra.mxu1 %v930_v4  ;;  %1312 = vmatprep.mubr.msk.bf16.mxu1 %vm1499_vm0, %v1498_v0 }
 0x3b2   :  { %v621_v8 = vsel %vm165_vm2, %v1376_v7, 0.0  ;;  %1322 = vmatprep.subr.bf16.mxu1 %v1498_v0  ;;  %v633_v13 = vpack.c.bf16 %v1376_v7, %v1376_v7 }
 0x3b3   :  { %622 = vadd.xlane.f32.xlu0 %v621_v8 }
 0x3b5   :  { %v1378_v9 = vpop.eup %1377 }
 0x3b6   :  { %v618_v11 = vsel %vm165_vm2, %v1378_v9, 0.0  ;;  %v632_v12 = vpack.c.bf16 %v1378_v9, %v1378_v9 }
 0x3b7   :  { %619 = vadd.xlane.f32.xlu1 %v618_v11 }
 0x3b8   :  { %1307 = vmatmul.mubr.msk.bf16.vlgmr.msra.gmra.mrb[28].mxu0 %vm165_vm2, %v632_v12  ;;  %1313 = vmatmul.mubr.msk.bf16.vlgmr.msra.gmra.mrb[28].mxu1 %vm165_vm2, %v633_v13 }
 0x3b9   :  { %v1380_v15 = vpop.eup %1379  ;;  %1317 = vmatpush3.bf16.msra.mxu0 %v978_v14  ;;  %1318 = vmatprep.mubr.msk.bf16.mxu0 %vm1499_vm0, %v1498_v0 }
 0x3ba   :  { %v624_v17 = vsel %vm165_vm2, %v1380_v15, 0.0  ;;  %1326 = vmatprep.mubr.msk.bf16.mxu1 %vm1499_vm0, %v1498_v0  ;;  %v634_v20 = vpack.c.bf16 %v1380_v15, %v1380_v15  ;;  %1323 = vmatpush3.bf16.msra.mxu1 %v1363_v45 }
 0x3bb   :  { %613 = vadd.xlane.f32.xlu1 %v612_v16  ;;  %625 = vadd.xlane.f32.xlu0 %v624_v17 }
 0x3bc   :  { %1324 = vmatprep.subr.bf16.mxu1 %v1498_v0 }
 0x3be   :  { %1325 = vmatpush3.bf16.msra.mxu1 %v1364_v60 }
 0x3bf   :  { %604 = vadd.xlane.f32.xlu1 %v603_v18  ;;  %616 = vadd.xlane.f32.xlu0 %v615_v19 }
 0x3c0   :  { %1319 = vmatmul.mubr.msk.bf16.vlgmr.msra.gmra.mrb[32].mxu0 %vm165_vm2, %v634_v20 }
 0x3e5   :  { %v1738_v21 = vpop.f32.mrb[16].mxu1 }
 0x3e6   :  { %v1278_v24 = vpop.f32.mrb[17].mxu1 }
 0x3e7   :  { %v681_v22 = vpop.f32.mrb[18].mxu1 }
 0x3e8   :  { %v1279_v28 = vpop.f32.mrb[19].mxu1 }
 0x407   :  { %v608_v39 = vpop.xlane.xlu0 %607 }
 0x408   :  { %1381 = vrcp.f32 %v608_v39 }
 0x40b   :  { %v611_v40 = vpop.xlane.xlu0 %610 }
 0x40c   :  { %1383 = vrcp.f32 %v611_v40 }
 0x412   :  { %v1382_v48 = vpop.eup %1381 }
 0x416   :  { %v1384_v49 = vpop.eup %1383 }
 0x440   :  { %v623_v41 = vpop.xlane.xlu0 %622 }
 0x441   :  { %1385 = vrcp.f32 %v623_v41 }
 0x444   :  { %v620_v42 = vpop.xlane.xlu1 %619 }
 0x445   :  { %1387 = vrcp.f32 %v620_v42 }
 0x448   :  { %v614_v27 = vpop.xlane.xlu1 %613  ;;  %v626_v46 = vpop.xlane.xlu0 %625 }
 0x449   :  { %1389 = vrcp.f32 %v614_v27 }
 0x44a   :  { %1391 = vrcp.f32 %v626_v46 }
 0x44b   :  { %v1386_v50 = vpop.eup %1385 }
 0x44c   :  { %v605_v12 = vpop.xlane.xlu1 %604  ;;  %v617_v13 = vpop.xlane.xlu0 %616 }
 0x44d   :  { %1393 = vrcp.f32 %v605_v12 }
 0x44e   :  { %v726_v29 = vpop.f32.mrb[20].mxu0  ;;  %1395 = vrcp.f32 %v617_v13 }
 0x44f   :  { %v1284_v30 = vpop.f32.mrb[21].mxu0  ;;  %v1388_v51 = vpop.eup %1387  ;;  %v1029_v54 = vmul.f32 %v1382_v48, %v726_v29 }
 0x450   :  { %v729_v23 = vpop.f32.mrb[22].mxu0 }
 0x451   :  { %v1285_v31 = vpop.f32.mrb[23].mxu0 }
 0x452   :  { %v774_v32 = vpop.f32.mrb[20].mxu1 }
 0x453   :  { %v1290_v33 = vpop.f32.mrb[21].mxu1  ;;  %v1030_v55 = vmul.f32 %v1384_v49, %v774_v32  ;;  %v1390_v0 = vpop.eup %1389 }
 0x454   :  { %v777_v34 = vpop.f32.mrb[22].mxu1  ;;  %v1392_v5 = vpop.eup %1391 }
 0x455   :  { %v1291_v25 = vpop.f32.mrb[23].mxu1 }
 0x456   :  { %v822_v35 = vpop.f32.mrb[24].mxu0 }
 0x457   :  { %v1296_v36 = vpop.f32.mrb[25].mxu0  ;;  %v1031_v4 = vmul.f32 %v1390_v0, %v822_v35  ;;  %v1394_v15 = vpop.eup %1393 }
 0x458   :  { %v825_v37 = vpop.f32.mrb[26].mxu0  ;;  %v1396_v19 = vpop.eup %1395  ;;  %v1028_v24 = vmul.f32 %v1394_v15, %v1738_v21  ;;  %v1176_v21 = vld [vmem:[%s1770_s4] ss:$0 sm:$0xff] }
 0x459   :  { %v1297_v38 = vpop.f32.mrb[27].mxu0 }
 0x483   :  { %v870_v43 = vpop.f32.mrb[24].mxu1 }
 0x484   :  { %v1302_v44 = vpop.f32.mrb[25].mxu1  ;;  %v1032_v20 = vmul.f32 %v1396_v19, %v870_v43 }
 0x485   :  { %v873_v26 = vpop.f32.mrb[26].mxu1 }
 0x486   :  { %v1303_v47 = vpop.f32.mrb[27].mxu1 }
 0x48b   :  { %v918_v52 = vpop.f32.mrb[28].mxu0  ;;  %v966_v53 = vpop.f32.mrb[28].mxu1 }
 0x48c   :  { %v1033_v56 = vmul.f32 %v1388_v51, %v918_v52  ;;  %v1034_v57 = vmul.f32 %v1386_v50, %v966_v53  ;;  %v1308_v58 = vpop.f32.mrb[29].mxu0  ;;  %v1314_v59 = vpop.f32.mrb[29].mxu1 }
 0x48d   :  { %v921_v61 = vpop.f32.mrb[30].mxu0  ;;  %v969_v62 = vpop.f32.mrb[30].mxu1 }
 0x48e   :  { %v1351_v63 = vpack.i.bf16 %v1034_v57, %v1030_v55  ;;  %v1309_v1 = vpop.f32.mrb[31].mxu0  ;;  %v1315_v2 = vpop.f32.mrb[31].mxu1  ;;  %v1346_v3 = vpack.i.bf16 %v1033_v56, %v1029_v54 }
 0x490   :  { %1352 = vrot.lane.b32.xlu0 %v1351_v63, %s1504_s2  ;;  %1347 = vrot.lane.b32.xlu1 %v1346_v3, %s1496_s17 }
 0x493   :  { %v1014_v6 = vpop.f32.mrb[32].mxu0 }
 0x494   :  { %v1035_v7 = vmul.f32 %v1392_v5, %v1014_v6  ;;  %v1320_v8 = vpop.f32.mrb[33].mxu0 }
 0x495   :  { %v1017_v9 = vpop.f32.mrb[34].mxu0 }
 0x496   :  { %v1356_v10 = vpack.i.bf16 %v1035_v7, %v1031_v4  ;;  %v1321_v11 = vpop.f32.mrb[35].mxu0 }
 0x498   :  { %1357 = vrot.lane.b32.xlu1 %v1356_v10, %s1505_s28 }
 0x502   :  { %v1348_v14 = vpop.permute.xlu1 %1347  ;;  %v1353_v16 = vpop.permute.xlu0 %1352 }
 0x503   :  { %v1350_v17 = vunpack.i.h.bf16 %v1348_v14  ;;  %v1349_v18 = vunpack.i.l.bf16 %v1348_v14  ;;  %v1355_v22 = vunpack.i.h.bf16 %v1353_v16  ;;  %v1354_v28 = vunpack.i.l.bf16 %v1353_v16 }
 0x505   :  { %v1061_v29 = vsel %vm165_vm2, %v1032_v20, %v1350_v17  ;;  %v1060_v30 = vsel %vm165_vm2, %v1028_v24, %v1349_v18 }
 0x506   :  { %v1063_v33 = vsel %vm1062_vm4, %v1060_v30, %v1354_v28  ;;  %v1064_v34 = vsel %vm1062_vm4, %v1061_v29, %v1355_v22 }
 0x50a   :  { %v1358_v23 = vpop.permute.xlu1 %1357 }
 0x50b   :  { %v1360_v31 = vunpack.i.h.bf16 %v1358_v23  ;;  %v1359_v32 = vunpack.i.l.bf16 %v1358_v23 }
 0x50d   :  { %v1067_v25 = vsel %vm1065_vm5, %v1064_v34, %v1360_v31  ;;  %v1066_v35 = vsel %vm1065_vm5, %v1063_v33, %v1359_v32 }
 0x50e   :  { %v1068_v36 = vpack.c.bf16 %v1067_v25, %v1066_v35 }
 0x510   :  { %1327 = vmatmul.mubr.msk.bf16.vlgmr.msra.gmra.mrb[32].mxu1 %vm89_vm1, %v1068_v36 }
 0x5e3   :  { %v1129_v37 = vpop.f32.mrb[32].mxu1 }
 0x5e4   :  { %v1130_v38 = vadd.f32 %v1176_v21, %v1129_v37  ;;  %v1328_v39 = vpop.f32.mrb[33].mxu1 }
 0x5e5   :  { %v1132_v40 = vpop.f32.mrb[34].mxu1 }
 0x5e6   :  { %1136 = vst.msk [vmem:[#allocation8] sm:$0xff] %vm89_vm1, %v1130_v38  ;;  %v1133_v41 = vadd.f32 %v1176_v21, %v1132_v40  ;;  %v1329_v42 = vpop.f32.mrb[35].mxu1 }
 0x5e8   :  { %1137 = vst.msk [vmem:[#allocation8 + $0x8] sm:$0xff] %vm89_vm1, %v1133_v41 }
 0x5e9   :  { %1474 = shalt.err (!%p1471_p0)
}
 0x5ea   :  { %s1475_s19 = scalar_lea.hbm %s1771_s5, 256 }
 0x5eb   :  { %p1476_p1 = scmp.ne.s32.totalorder %s1771_s5, %s1475_s19  ;;  %p1479_p2 = scmp.lt.u32.totalorder %s1475_s19, %s1771_s5 }
 0x5ed   :  { %p1481_p3 = pnand %p1479_p2, %p1476_p1 }
 0x5ef   :  { %1484 = shalt.err (!%p1481_p3)
}
 0x5f0   :  { %1149 = dma.vmem_to_hbm [thread:$0]  %s1144_s15, 256, %s1771_s5, [#allocation4], %s1495_s1, %s1495_s1, %s1496_s17  }
 0x5f1   :  { %1489 = dma.done.wait [#allocation4], 256  }
 0x5f2   :  { %1490 = vsyncadd [#allocation4], 4294967040 }
 0x5f3   :  { %1153 = vsyncpa [#allocation3], 1 }
 0x5f4   :  { %1154 = vsyncpa [#allocation6], 1 }
 0x5f5   :  { %1155 = vsyncpa [#allocation4], 1 }

// kernel: tpu_custom_call.1
= control target key start
LH: loop header
LB: loop body
LE: loop exit
PB: predicated region body
PF: predicated region fallthrough
CT: control target
= control target key end

     0   :  { %10 = vsyncpa [#allocation3], 0  ;;  %s1766_s0 = inlined_call_operand.hbm [shape: f32[2,8,32], index: 0, kind: input, shape index: {}]   ;;  %s1767_s1 = inlined_call_operand.hbm [shape: bf16[32,96], index: 1, kind: input, shape index: {}]   ;;  %s1768_s2 = inlined_call_operand.vmem [shape: f32[1,96], index: 2, kind: input, shape index: {}]   ;;  %s1769_s3 = inlined_call_operand.hbm [shape: bf16[32,32], index: 3, kind: input, shape index: {}]   ;;  %s1770_s4 = inlined_call_operand.vmem [shape: f32[1,32], index: 4, kind: input, shape index: {}]   ;;  %s1771_s5 = inlined_call_operand.hbm [shape: f32[2,8,32], index: 5, kind: output, shape index: {}]  }
   0x1   :  { %11 = vsyncpa [#allocation6], 0 }
   0x2   :  { %12 = vsyncpa [#allocation4], 0  ;;  %s1491_s18 = smov [#allocation5]   ;;  %s1397_s22 = scalar_lea.hbm %s1767_s1, 256 }
   0x3   :  { %s30_s19 = sshll.u32 %s1491_s18, 4  ;;  %p1398_p0 = scmp.ne.s32.totalorder %s1767_s1, %s1397_s22  ;;  %s31_s19 = int_to_ptr.vmem [resolvable:$true] %s30_s19 }
   0x4   :  { %p1401_p1 = scmp.lt.u32.totalorder %s1397_s22, %s1767_s1 }
   0x6   :  { %p1403_p2 = pnand %p1401_p1, %p1398_p0 }
   0x8   :  { %1406 = shalt.err (!%p1403_p2)
}
   0x9   :  { %s1407_s27 = scalar_lea.vmem %s31_s19, 256  ;;  %p1412_p4 = scmp.lt.s32.totalorder %s31_s19, %s31_s19 }
   0xa   :  { %p1408_p3 = scmp.ne.s32.totalorder %s31_s19, %s1407_s27  ;;  %p1413_p5 = scmp.lt.s32.totalorder %s1407_s27, %s1407_s27 }
   0xc   :  { %p1414_p6 = por %p1413_p5, %p1412_p4 }
   0xe   :  { %p1415_p7 = pnand %p1414_p6, %p1408_p3 }
  0x10   :  { %1418 = shalt.err (!%p1415_p7)
}
  0x11   :  { %s1492_s28 = smov 64   ;;  %s1493_s29 = smov 4  }
  0x12   :  { %36 = dma.hbm_to_vmem [thread:$0]  %s1767_s1, 256, %s31_s19, [#allocation6], %s1492_s28, %s1492_s28, %s1493_s29  }
  0x13   :  { %s1494_s7 = smov [#allocation2]   ;;  %s1419_s11 = scalar_lea.hbm %s1766_s0, 256 }
  0x14   :  { %s18_s8 = sshll.u32 %s1494_s7, 4  ;;  %p1420_p8 = scmp.ne.s32.totalorder %s1766_s0, %s1419_s11  ;;  %s19_s8 = int_to_ptr.vmem [resolvable:$true] %s18_s8 }
  0x15   :  { %p1423_p9 = scmp.lt.u32.totalorder %s1419_s11, %s1766_s0 }
  0x17   :  { %p1425_p10 = pnand %p1423_p9, %p1420_p8 }
  0x19   :  { %1428 = shalt.err (!%p1425_p10)
}
  0x1a   :  { %s1429_s16 = scalar_lea.vmem %s19_s8, 256  ;;  %p1434_p12 = scmp.lt.s32.totalorder %s19_s8, %s19_s8 }
  0x1b   :  { %p1430_p11 = scmp.ne.s32.totalorder %s19_s8, %s1429_s16  ;;  %p1435_p13 = scmp.lt.s32.totalorder %s1429_s16, %s1429_s16 }
  0x1d   :  { %p1436_p0 = por %p1435_p13, %p1434_p12 }
  0x1f   :  { %p1437_p1 = pnand %p1436_p0, %p1430_p11 }
  0x21   :  { %1440 = shalt.err (!%p1437_p1)
}
  0x22   :  { %s1495_s1 = smov 128   ;;  %s1496_s17 = smov 8  }
  0x23   :  { %24 = dma.hbm_to_vmem [thread:$0]  %s1766_s0, 256, %s19_s8, [#allocation3], %s1495_s1, %s1495_s1, %s1496_s17  }
  0x24   :  { %s1497_s20 = smov [#allocation7]   ;;  %s1441_s24 = scalar_lea.hbm %s1769_s3, 256 }
  0x25   :  { %s44_s21 = sshll.u32 %s1497_s20, 4  ;;  %p1442_p2 = scmp.ne.s32.totalorder %s1769_s3, %s1441_s24  ;;  %s45_s21 = int_to_ptr.vmem [resolvable:$true] %s44_s21 }
  0x26   :  { %p1445_p3 = scmp.lt.u32.totalorder %s1441_s24, %s1769_s3 }
  0x28   :  { %p1447_p4 = pnand %p1445_p3, %p1442_p2 }
  0x2a   :  { %1450 = shalt.err (!%p1447_p4)
}
  0x2b   :  { %s1451_s6 = scalar_lea.vmem %s45_s21, 256  ;;  %p1456_p6 = scmp.lt.s32.totalorder %s45_s21, %s45_s21 }
  0x2c   :  { %p1452_p5 = scmp.ne.s32.totalorder %s45_s21, %s1451_s6  ;;  %p1457_p7 = scmp.lt.s32.totalorder %s1451_s6, %s1451_s6 }
  0x2e   :  { %p1458_p8 = por %p1457_p7, %p1456_p6 }
  0x30   :  { %p1459_p9 = pnand %p1458_p8, %p1452_p5 }
  0x32   :  { %1462 = shalt.err (!%p1459_p9)
}
  0x33   :  { %50 = dma.hbm_to_vmem [thread:$0]  %s1769_s3, 256, %s45_s21, [#allocation6], %s1492_s28, %s1492_s28, %s1493_s29  }
  0x34   :  { %1485 = dma.done.wait [#allocation3], 256  }
  0x35   :  { %1486 = vsyncadd [#allocation3], 4294967040 }
  0x36   :  { %1487 = dma.done.wait [#allocation6], 512  }
  0x37   :  { %1488 = vsyncadd [#allocation6], 4294966784  ;;  %v1498_v0 = vmov 0.0   ;;  %vm1499_vm0 = vmmov 0   ;;  %v1361_v1 = vld [vmem:[#allocation5] sm:$0xff]   ;;  %v1362_v2 = vld [vmem:[#allocation5 + $0x8] sm:$0xff]  }
  0x38   :  { %1218 = vmatprep.subr.bf16.mxu0 %v1498_v0  ;;  %1222 = vmatprep.mubr.msk.bf16.mxu0 %vm1499_vm0, %v1498_v0  ;;  %v63_v3 = vld [vmem:[#allocation2] sm:$0xff]  ;;  %v64_v4 = vld [vmem:[#allocation2 + $0x8] sm:$0xff]  ;;  %vm89_vm1 = vcmask 261120   ;;  %s1500_s8 = smov 104   ;;  %s1501_s9 = smov 120   ;;  %vm165_vm2 = vcmask 64512  }
  0x39   :  { %1226 = vmatprep.subr.bf16.mxu1 %v1498_v0  ;;  %1228 = vmatprep.mubr.msk.bf16.mxu1 %vm1499_vm0, %v1498_v0  ;;  %v65_v5 = vpack.c.bf16 %v64_v4, %v63_v3  ;;  %v1156_v6 = vld [vmem:[%s1768_s2] ss:$0 sm:$0xff]  ;;  %s1502_s10 = smov 112   ;;  %s1503_s11 = smov 96   ;;  %vm640_vm3 = vcmask 1043456   ;;  %vm1062_vm4 = vcmask 130048  }
  0x3a   :  { %1219 = vmatpush3.bf16.msra.mxu0 %v1361_v1  ;;  %s1504_s2 = smov 16   ;;  %vm1065_vm5 = vcmask 195584   ;;  %s1506_s14 = smov [#allocation8]  }
  0x3b   :  { %1220 = vmatprep.subr.bf16.mxu0 %v1498_v0  ;;  %s1143_s15 = sshll.u32 %s1506_s14, 4  ;;  %s1144_s15 = int_to_ptr.vmem [resolvable:$true] %s1143_s15 }
  0x3c   :  { %s1463_s16 = scalar_lea.vmem %s1144_s15, 256  ;;  %p1468_p11 = scmp.lt.s32.totalorder %s1144_s15, %s1144_s15 }
  0x3d   :  { %p1464_p10 = scmp.ne.s32.totalorder %s1144_s15, %s1463_s16  ;;  %p1469_p12 = scmp.lt.s32.totalorder %s1463_s16, %s1463_s16 }
  0x3e   :  { %1221 = vmatpush3.bf16.msra.mxu0 %v1362_v2 }
  0x3f   :  { %1232 = vmatprep.subr.bf16.mxu0 %v1498_v0  ;;  %p1470_p13 = por %p1469_p12, %p1468_p11 }
  0x41   :  { %1223 = vmatmul.mubr.msk.bf16.vlgmr.msra.gmra.mrb[0].mxu0 %vm89_vm1, %v65_v5  ;;  %p1471_p0 = pnand %p1470_p13, %p1464_p10 }
  0x42   :  { %1234 = vmatprep.mubr.msk.bf16.mxu0 %vm1499_vm0, %v1498_v0 }
 0x114   :  { %v127_v7 = vpop.f32.mrb[0].mxu0 }
 0x115   :  { %v128_v8 = vadd.f32 %v1156_v6, %v127_v7  ;;  %v1224_v9 = vpop.f32.mrb[1].mxu0 }
 0x116   :  { %v130_v10 = vpop.f32.mrb[2].mxu0 }
 0x117   :  { %148 = vrot.lane.b32.xlu1 %v128_v8, %s1500_s8  ;;  %136 = vrot.lane.b32.xlu0 %v128_v8, %s1501_s9  ;;  %v1225_v11 = vpop.f32.mrb[3].mxu0  ;;  %v131_v12 = vadd.f32 %v1156_v6, %v130_v10  ;;  %v154_v13 = vpack.c.bf16 %v128_v8, %v128_v8 }
 0x119   :  { %v1598_v23 = vpack.c.bf16 %v131_v12, %v131_v12 }
 0x11b   :  { %142 = vrot.lane.b32.xlu0 %v128_v8, %s1502_s10  ;;  %138 = vrot.lane.b32.xlu1 %v131_v12, %s1501_s9 }
 0x11f   :  { %144 = vrot.lane.b32.xlu0 %v131_v12, %s1502_s10  ;;  %150 = vrot.lane.b32.xlu1 %v131_v12, %s1500_s8 }
 0x123   :  { %163 = vrot.lane.b32.xlu0 %v154_v13, %s1503_s11 }
 0x189   :  { %v149_v14 = vpop.permute.xlu1 %148  ;;  %v137_v15 = vpop.permute.xlu0 %136 }
 0x18a   :  { %v155_v16 = vpack.c.bf16 %v137_v15, %v137_v15  ;;  %v157_v19 = vpack.c.bf16 %v149_v14, %v149_v14 }
 0x18c   :  { %213 = vrot.lane.b32.xlu1 %v155_v16, %s1503_s11 }
 0x18d   :  { %v143_v17 = vpop.permute.xlu0 %142  ;;  %v139_v18 = vpop.permute.xlu1 %138 }
 0x18e   :  { %v156_v20 = vpack.c.bf16 %v143_v17, %v143_v17  ;;  %v1596_v22 = vpack.c.bf16 %v139_v18, %v139_v18 }
 0x190   :  { %262 = vrot.lane.b32.xlu0 %v156_v20, %s1503_s11  ;;  %311 = vrot.lane.b32.xlu1 %v157_v19, %s1503_s11 }
 0x191   :  { %v145_v21 = vpop.permute.xlu0 %144  ;;  %v151_v24 = vpop.permute.xlu1 %150 }
 0x192   :  { %v1602_v26 = vpack.c.bf16 %v145_v21, %v145_v21  ;;  %v1604_v27 = vpack.c.bf16 %v151_v24, %v151_v24 }
 0x194   :  { %409 = vrot.lane.b32.xlu1 %v1596_v22, %s1503_s11  ;;  %360 = vrot.lane.b32.xlu0 %v1598_v23, %s1503_s11 }
 0x195   :  { %v164_v25 = vpop.permute.xlu0 %163 }
 0x196   :  { %v170_v28 = vsel %vm165_vm2, %v164_v25, 0 }
 0x197   :  { %1227 = vmatpush3.bf16.xpose.msra.mxu1 %v170_v28 }
 0x198   :  { %507 = vrot.lane.b32.xlu1 %v1604_v27, %s1503_s11  ;;  %458 = vrot.lane.b32.xlu0 %v1602_v26, %s1503_s11 }
 0x199   :  { %1238 = vmatprep.subr.bf16.mxu1 %v1498_v0 }
 0x19c   :  { %635 = vrot.lane.b32.xlu1 %v154_v13, %s1492_s28  ;;  %684 = vrot.lane.b32.xlu0 %v155_v16, %s1492_s28 }
 0x19e   :  { %1229 = vmatmul.mubr.msk.bf16.vlgmr.msra.gmra.mrb[0].mxu1 %vm165_vm2, %v154_v13 }
 0x19f   :  { %1240 = vmatprep.mubr.msk.bf16.mxu1 %vm1499_vm0, %v1498_v0 }
 0x1a0   :  { %732 = vrot.lane.b32.xlu1 %v156_v20, %s1492_s28 }
 0x1a4   :  { %780 = vrot.lane.b32.xlu1 %v157_v19, %s1492_s28 }
 0x1fe   :  { %v214_v29 = vpop.permute.xlu1 %213 }
 0x1ff   :  { %v219_v30 = vsel %vm165_vm2, %v214_v29, 0 }
 0x200   :  { %1233 = vmatpush3.bf16.xpose.msra.mxu0 %v219_v30 }
 0x201   :  { %1244 = vmatprep.subr.bf16.mxu0 %v1498_v0 }
 0x202   :  { %v263_v31 = vpop.permute.xlu0 %262  ;;  %v312_v33 = vpop.permute.xlu1 %311 }
 0x203   :  { %v268_v32 = vsel %vm165_vm2, %v263_v31, 0  ;;  %v317_v34 = vsel %vm165_vm2, %v312_v33, 0 }
 0x204   :  { %1239 = vmatpush3.bf16.xpose.msra.mxu1 %v268_v32 }
 0x205   :  { %1250 = vmatprep.subr.bf16.mxu1 %v1498_v0 }
 0x206   :  { %v361_v35 = vpop.permute.xlu0 %360  ;;  %v410_v37 = vpop.permute.xlu1 %409 }
 0x207   :  { %1235 = vmatmul.mubr.msk.bf16.vlgmr.msra.gmra.mrb[4].mxu0 %vm165_vm2, %v155_v16  ;;  %v366_v36 = vsel %vm165_vm2, %v361_v35, 0  ;;  %v415_v38 = vsel %vm165_vm2, %v410_v37, 0 }
 0x208   :  { %1245 = vmatpush3.bf16.xpose.msra.mxu0 %v317_v34  ;;  %1246 = vmatprep.mubr.msk.bf16.mxu0 %vm1499_vm0, %v1498_v0 }
 0x209   :  { %1256 = vmatprep.subr.bf16.mxu0 %v1498_v0 }
 0x20a   :  { %v459_v39 = vpop.permute.xlu0 %458  ;;  %v508_v40 = vpop.permute.xlu1 %507 }
 0x20b   :  { %1241 = vmatmul.mubr.msk.bf16.vlgmr.msra.gmra.mrb[4].mxu1 %vm165_vm2, %v156_v20  ;;  %v464_v41 = vsel %vm165_vm2, %v459_v39, 0  ;;  %v513_v42 = vsel %vm165_vm2, %v508_v40, 0 }
 0x20c   :  { %1251 = vmatpush3.bf16.xpose.msra.mxu1 %v366_v36  ;;  %1252 = vmatprep.mubr.msk.bf16.mxu1 %vm1499_vm0, %v1498_v0 }
 0x20d   :  { %1262 = vmatprep.subr.bf16.mxu1 %v1498_v0 }
 0x20e   :  { %v636_v43 = vpop.permute.xlu1 %635  ;;  %v685_v45 = vpop.permute.xlu0 %684 }
 0x20f   :  { %1247 = vmatmul.mubr.msk.bf16.vlgmr.msra.gmra.mrb[8].mxu0 %vm165_vm2, %v157_v19  ;;  %v642_v44 = vsel %vm640_vm3, %v636_v43, 0  ;;  %v690_v46 = vsel %vm640_vm3, %v685_v45, 0 }
 0x210   :  { %1257 = vmatpush3.bf16.xpose.msra.mxu0 %v415_v38  ;;  %1258 = vmatprep.mubr.msk.bf16.mxu0 %vm1499_vm0, %v1498_v0 }
 0x211   :  { %1268 = vmatprep.subr.bf16.mxu0 %v1498_v0 }
 0x213   :  { %1253 = vmatmul.mubr.msk.bf16.vlgmr.msra.gmra.mrb[8].mxu1 %vm165_vm2, %v1598_v23 }
 0x214   :  { %1263 = vmatpush3.bf16.xpose.msra.mxu1 %v464_v41  ;;  %1264 = vmatprep.mubr.msk.bf16.mxu1 %vm1499_vm0, %v1498_v0 }
 0x215   :  { %1274 = vmatprep.subr.bf16.mxu1 %v1498_v0 }
 0x217   :  { %1259 = vmatmul.mubr.msk.bf16.vlgmr.msra.gmra.mrb[12].mxu0 %vm165_vm2, %v1596_v22 }
 0x218   :  { %1269 = vmatpush3.bf16.xpose.msra.mxu0 %v513_v42  ;;  %1270 = vmatprep.mubr.msk.bf16.mxu0 %vm1499_vm0, %v1498_v0 }
 0x219   :  { %1280 = vmatprep.subr.bf16.mxu0 %v1498_v0 }
 0x21b   :  { %1265 = vmatmul.mubr.msk.bf16.vlgmr.msra.gmra.mrb[12].mxu1 %vm165_vm2, %v1602_v26 }
 0x21c   :  { %1275 = vmatpush3.bf16.msra.mxu1 %v642_v44  ;;  %1276 = vmatprep.mubr.msk.bf16.mxu1 %vm1499_vm0, %v1498_v0 }
 0x21d   :  { %1286 = vmatprep.subr.bf16.mxu1 %v1498_v0 }
 0x21f   :  { %1271 = vmatmul.mubr.msk.bf16.vlgmr.msra.gmra.mrb[16].mxu0 %vm165_vm2, %v1604_v27 }
 0x220   :  { %1281 = vmatpush3.bf16.msra.mxu0 %v690_v46  ;;  %1282 = vmatprep.mubr.msk.bf16.mxu0 %vm1499_vm0, %v1498_v0 }
 0x221   :  { %1292 = vmatprep.subr.bf16.mxu0 %v1498_v0 }
 0x271   :  { %v206_v47 = vpop.f32.mrb[0].mxu1 }
 0x272   :  { %v1230_v48 = vpop.f32.mrb[1].mxu1  ;;  %v555_v49 = vsel %vm165_vm2, %v206_v47, -inf }
 0x273   :  { %v209_v50 = vpop.f32.mrb[2].mxu1  ;;  %556 = vmax.xlane.f32.xlu0 %v555_v49 }
 0x274   :  { %v1231_v51 = vpop.f32.mrb[3].mxu1 }
 0x2da   :  { %v255_v52 = vpop.f32.mrb[4].mxu0 }
 0x2db   :  { %v1236_v53 = vpop.f32.mrb[5].mxu0  ;;  %v558_v54 = vsel %vm165_vm2, %v255_v52, -inf }
 0x2dc   :  { %559 = vmax.xlane.f32.xlu1 %v558_v54  ;;  %v258_v55 = vpop.f32.mrb[6].mxu0 }
 0x2dd   :  { %v1237_v56 = vpop.f32.mrb[7].mxu0 }
 0x2de   :  { %v304_v57 = vpop.f32.mrb[4].mxu1 }
 0x2df   :  { %v1242_v58 = vpop.f32.mrb[5].mxu1  ;;  %v561_v59 = vsel %vm165_vm2, %v304_v57, -inf }
 0x2e0   :  { %v307_v60 = vpop.f32.mrb[6].mxu1  ;;  %562 = vmax.xlane.f32.xlu0 %v561_v59 }
 0x2e1   :  { %v1243_v61 = vpop.f32.mrb[7].mxu1 }
 0x2e2   :  { %v353_v62 = vpop.f32.mrb[8].mxu0 }
 0x2e3   :  { %v1248_v63 = vpop.f32.mrb[9].mxu0  ;;  %v564_v1 = vsel %vm165_vm2, %v353_v62, -inf }
 0x2e4   :  { %565 = vmax.xlane.f32.xlu0 %v564_v1  ;;  %v356_v2 = vpop.f32.mrb[10].mxu0 }
 0x2e5   :  { %v1249_v3 = vpop.f32.mrb[11].mxu0 }
 0x2e6   :  { %v1664_v4 = vpop.f32.mrb[8].mxu1 }
 0x2e7   :  { %v1254_v5 = vpop.f32.mrb[9].mxu1  ;;  %v567_v28 = vsel %vm165_vm2, %v1664_v4, -inf }
 0x2e8   :  { %v405_v6 = vpop.f32.mrb[10].mxu1 }
 0x2e9   :  { %v1255_v7 = vpop.f32.mrb[11].mxu1 }
 0x2ea   :  { %v1666_v8 = vpop.f32.mrb[12].mxu0 }
 0x2eb   :  { %v1260_v9 = vpop.f32.mrb[13].mxu0  ;;  %v570_v31 = vsel %vm165_vm2, %v1666_v8, -inf }
 0x2ec   :  { %v454_v10 = vpop.f32.mrb[14].mxu0 }
 0x2ed   :  { %876 = vrot.lane.b32.xlu1 %v1596_v22, %s1492_s28  ;;  %v1261_v11 = vpop.f32.mrb[15].mxu0  ;;  %v733_v22 = vpop.permute.xlu1 %732 }
 0x2ee   :  { %v1670_v12 = vpop.f32.mrb[12].mxu1  ;;  %v738_v30 = vsel %vm640_vm3, %v733_v22, 0 }
 0x2ef   :  { %v1266_v13 = vpop.f32.mrb[13].mxu1 }
 0x2f0   :  { %v503_v14 = vpop.f32.mrb[14].mxu1 }
 0x2f1   :  { %v1267_v15 = vpop.f32.mrb[15].mxu1  ;;  %v781_v33 = vpop.permute.xlu1 %780 }
 0x2f2   :  { %v1672_v16 = vpop.f32.mrb[16].mxu0 }
 0x2f3   :  { %v1272_v17 = vpop.f32.mrb[17].mxu0  ;;  %v576_v32 = vsel %vm165_vm2, %v1672_v16, -inf }
 0x2f4   :  { %v552_v18 = vpop.f32.mrb[18].mxu0 }
 0x2f5   :  { %v1273_v19 = vpop.f32.mrb[19].mxu0 }
 0x2fa   :  { %828 = vrot.lane.b32.xlu0 %v1598_v23, %s1492_s28  ;;  %v573_v23 = vsel %vm165_vm2, %v1670_v12, -inf }
 0x300   :  { %v557_v20 = vpop.xlane.xlu0 %556 }
 0x301   :  { %v579_v21 = vsub.f32 %v206_v47, %v557_v20 }
 0x303   :  { %v587_v24 = vmul.f32 1.442695, %v579_v21 }
 0x305   :  { %1365 = vpow2.f32 %v587_v24 }
 0x30f   :  { %v1676_v25 = vpop.eup %1365 }
 0x310   :  { %v627_v29 = vpack.c.bf16 %v1676_v25, %v1676_v25  ;;  %v603_v18 = vsel %vm165_vm2, %v1676_v25, 0.0 }
 0x311   :  { %568 = vmax.xlane.f32.xlu1 %v567_v28 }
 0x312   :  { %1277 = vmatmul.mubr.msk.bf16.vlgmr.msra.gmra.mrb[16].mxu1 %vm165_vm2, %v627_v29 }
 0x313   :  { %1287 = vmatpush3.bf16.msra.mxu1 %v738_v30  ;;  %1288 = vmatprep.mubr.msk.bf16.mxu1 %vm1499_vm0, %v1498_v0 }
 0x314   :  { %1298 = vmatprep.subr.bf16.mxu1 %v1498_v0 }
 0x315   :  { %574 = vmax.xlane.f32.xlu1 %v573_v23 }
 0x319   :  { %571 = vmax.xlane.f32.xlu0 %v570_v31 }
 0x31d   :  { %577 = vmax.xlane.f32.xlu0 %v576_v32 }
 0x326   :  { %972 = vrot.lane.b32.xlu1 %v1604_v27, %s1492_s28 }
 0x333   :  { %924 = vrot.lane.b32.xlu0 %v1602_v26, %s1492_s28  ;;  %v786_v26 = vsel %vm640_vm3, %v781_v33, 0  ;;  %s1505_s28 = smov 24  }
 0x369   :  { %v560_v34 = vpop.xlane.xlu1 %559 }
 0x36a   :  { %v580_v35 = vsub.f32 %v255_v52, %v560_v34 }
 0x36c   :  { %v589_v36 = vmul.f32 1.442695, %v580_v35 }
 0x36d   :  { %v563_v37 = vpop.xlane.xlu0 %562  ;;  %v877_v51 = vpop.permute.xlu1 %876 }
 0x36e   :  { %1367 = vpow2.f32 %v589_v36  ;;  %v581_v38 = vsub.f32 %v304_v57, %v563_v37  ;;  %v882_v53 = vsel %vm640_vm3, %v877_v51, 0 }
 0x370   :  { %v591_v39 = vmul.f32 1.442695, %v581_v38 }
 0x371   :  { %v566_v40 = vpop.xlane.xlu0 %565 }
 0x372   :  { %1369 = vpow2.f32 %v591_v39  ;;  %v582_v41 = vsub.f32 %v353_v62, %v566_v40 }
 0x374   :  { %v593_v42 = vmul.f32 1.442695, %v582_v41 }
 0x375   :  { %v829_v46 = vpop.permute.xlu0 %828 }
 0x376   :  { %1371 = vpow2.f32 %v593_v42  ;;  %v834_v49 = vsel %vm640_vm3, %v829_v46, 0 }
 0x378   :  { %v1368_v43 = vpop.eup %1367 }
 0x379   :  { %v606_v44 = vsel %vm165_vm2, %v1368_v43, 0.0  ;;  %v628_v27 = vpack.c.bf16 %v1368_v43, %v1368_v43 }
 0x37a   :  { %607 = vadd.xlane.f32.xlu0 %v606_v44 }
 0x37b   :  { %1283 = vmatmul.mubr.msk.bf16.vlgmr.msra.gmra.mrb[20].mxu0 %vm165_vm2, %v628_v27 }
 0x37c   :  { %v1370_v45 = vpop.eup %1369  ;;  %1293 = vmatpush3.bf16.msra.mxu0 %v786_v26  ;;  %1294 = vmatprep.mubr.msk.bf16.mxu0 %vm1499_vm0, %v1498_v0 }
 0x37d   :  { %v609_v47 = vsel %vm165_vm2, %v1370_v45, 0.0  ;;  %v629_v48 = vpack.c.bf16 %v1370_v45, %v1370_v45  ;;  %1304 = vmatprep.subr.bf16.mxu0 %v1498_v0  ;;  %v1363_v45 = vld [vmem:[#allocation7] sm:$0xff]  }
 0x37e   :  { %610 = vadd.xlane.f32.xlu0 %v609_v47 }
 0x37f   :  { %1289 = vmatmul.mubr.msk.bf16.vlgmr.msra.gmra.mrb[20].mxu1 %vm165_vm2, %v629_v48 }
 0x380   :  { %v1372_v50 = vpop.eup %1371  ;;  %1299 = vmatpush3.bf16.msra.mxu1 %v834_v49  ;;  %1300 = vmatprep.mubr.msk.bf16.mxu1 %vm1499_vm0, %v1498_v0 }
 0x381   :  { %v630_v52 = vpack.c.bf16 %v1372_v50, %v1372_v50  ;;  %1310 = vmatprep.subr.bf16.mxu1 %v1498_v0 }
 0x383   :  { %1295 = vmatmul.mubr.msk.bf16.vlgmr.msra.gmra.mrb[24].mxu0 %vm165_vm2, %v630_v52 }
 0x384   :  { %1305 = vmatpush3.bf16.msra.mxu0 %v882_v53  ;;  %1306 = vmatprep.mubr.msk.bf16.mxu0 %vm1499_vm0, %v1498_v0 }
 0x385   :  { %1316 = vmatprep.subr.bf16.mxu0 %v1498_v0 }
 0x39e   :  { %v569_v54 = vpop.xlane.xlu1 %568 }
 0x39f   :  { %v583_v55 = vsub.f32 %v1664_v4, %v569_v54 }
 0x3a1   :  { %v595_v56 = vmul.f32 1.442695, %v583_v55 }
 0x3a2   :  { %v575_v57 = vpop.xlane.xlu1 %574 }
 0x3a3   :  { %1373 = vpow2.f32 %v595_v56  ;;  %v585_v58 = vsub.f32 %v1670_v12, %v575_v57 }
 0x3a5   :  { %v599_v59 = vmul.f32 1.442695, %v585_v58 }
 0x3a6   :  { %v572_v60 = vpop.xlane.xlu0 %571  ;;  %v973_v10 = vpop.permute.xlu1 %972 }
 0x3a7   :  { %1375 = vpow2.f32 %v599_v59  ;;  %v584_v61 = vsub.f32 %v1666_v8, %v572_v60  ;;  %v978_v14 = vsel %vm640_vm3, %v973_v10, 0  ;;  %v1364_v60 = vld [vmem:[#allocation7 + $0x8] sm:$0xff]  }
 0x3a9   :  { %v597_v62 = vmul.f32 1.442695, %v584_v61 }
 0x3aa   :  { %v578_v63 = vpop.xlane.xlu0 %577 }
 0x3ab   :  { %1377 = vpow2.f32 %v597_v62  ;;  %v586_v1 = vsub.f32 %v1672_v16, %v578_v63  ;;  %v612_v16 = vsel %vm165_vm2, %v1372_v50, 0.0 }
 0x3ad   :  { %v1374_v2 = vpop.eup %1373  ;;  %v601_v3 = vmul.f32 1.442695, %v586_v1 }
 0x3ae   :  { %v925_v5 = vpop.permute.xlu0 %924  ;;  %v631_v6 = vpack.c.bf16 %v1374_v2, %v1374_v2  ;;  %v615_v19 = vsel %vm165_vm2, %v1374_v2, 0.0 }
 0x3af   :  { %1379 = vpow2.f32 %v601_v3  ;;  %v930_v4 = vsel %vm640_vm3, %v925_v5, 0 }
 0x3b0   :  { %1301 = vmatmul.mubr.msk.bf16.vlgmr.msra.gmra.mrb[24].mxu1 %vm165_vm2, %v631_v6 }
 0x3b1   :  { %v1376_v7 = vpop.eup %1375  ;;  %1311 = vmatpush3.bf16.msra.mxu1 %v930_v4  ;;  %1312 = vmatprep.mubr.msk.bf16.mxu1 %vm1499_vm0, %v1498_v0 }
 0x3b2   :  { %v621_v8 = vsel %vm165_vm2, %v1376_v7, 0.0  ;;  %1322 = vmatprep.subr.bf16.mxu1 %v1498_v0  ;;  %v633_v13 = vpack.c.bf16 %v1376_v7, %v1376_v7 }
 0x3b3   :  { %622 = vadd.xlane.f32.xlu0 %v621_v8 }
 0x3b5   :  { %v1378_v9 = vpop.eup %1377 }
 0x3b6   :  { %v618_v11 = vsel %vm165_vm2, %v1378_v9, 0.0  ;;  %v632_v12 = vpack.c.bf16 %v1378_v9, %v1378_v9 }
 0x3b7   :  { %619 = vadd.xlane.f32.xlu1 %v618_v11 }
 0x3b8   :  { %1307 = vmatmul.mubr.msk.bf16.vlgmr.msra.gmra.mrb[28].mxu0 %vm165_vm2, %v632_v12  ;;  %1313 = vmatmul.mubr.msk.bf16.vlgmr.msra.gmra.mrb[28].mxu1 %vm165_vm2, %v633_v13 }
 0x3b9   :  { %v1380_v15 = vpop.eup %1379  ;;  %1317 = vmatpush3.bf16.msra.mxu0 %v978_v14  ;;  %1318 = vmatprep.mubr.msk.bf16.mxu0 %vm1499_vm0, %v1498_v0 }
 0x3ba   :  { %v624_v17 = vsel %vm165_vm2, %v1380_v15, 0.0  ;;  %1326 = vmatprep.mubr.msk.bf16.mxu1 %vm1499_vm0, %v1498_v0  ;;  %v634_v20 = vpack.c.bf16 %v1380_v15, %v1380_v15  ;;  %1323 = vmatpush3.bf16.msra.mxu1 %v1363_v45 }
 0x3bb   :  { %613 = vadd.xlane.f32.xlu1 %v612_v16  ;;  %625 = vadd.xlane.f32.xlu0 %v624_v17 }
 0x3bc   :  { %1324 = vmatprep.subr.bf16.mxu1 %v1498_v0 }
 0x3be   :  { %1325 = vmatpush3.bf16.msra.mxu1 %v1364_v60 }
 0x3bf   :  { %604 = vadd.xlane.f32.xlu1 %v603_v18  ;;  %616 = vadd.xlane.f32.xlu0 %v615_v19 }
 0x3c0   :  { %1319 = vmatmul.mubr.msk.bf16.vlgmr.msra.gmra.mrb[32].mxu0 %vm165_vm2, %v634_v20 }
 0x3e5   :  { %v1738_v21 = vpop.f32.mrb[16].mxu1 }
 0x3e6   :  { %v1278_v24 = vpop.f32.mrb[17].mxu1 }
 0x3e7   :  { %v681_v22 = vpop.f32.mrb[18].mxu1 }
 0x3e8   :  { %v1279_v28 = vpop.f32.mrb[19].mxu1 }
 0x407   :  { %v608_v39 = vpop.xlane.xlu0 %607 }
 0x408   :  { %1381 = vrcp.f32 %v608_v39 }
 0x40b   :  { %v611_v40 = vpop.xlane.xlu0 %610 }
 0x40c   :  { %1383 = vrcp.f32 %v611_v40 }
 0x412   :  { %v1382_v48 = vpop.eup %1381 }
 0x416   :  { %v1384_v49 = vpop.eup %1383 }
 0x440   :  { %v623_v41 = vpop.xlane.xlu0 %622 }
 0x441   :  { %1385 = vrcp.f32 %v623_v41 }
 0x444   :  { %v620_v42 = vpop.xlane.xlu1 %619 }
 0x445   :  { %1387 = vrcp.f32 %v620_v42 }
 0x448   :  { %v614_v27 = vpop.xlane.xlu1 %613  ;;  %v626_v46 = vpop.xlane.xlu0 %625 }
 0x449   :  { %1389 = vrcp.f32 %v614_v27 }
 0x44a   :  { %1391 = vrcp.f32 %v626_v46 }
 0x44b   :  { %v1386_v50 = vpop.eup %1385 }
 0x44c   :  { %v605_v12 = vpop.xlane.xlu1 %604  ;;  %v617_v13 = vpop.xlane.xlu0 %616 }
 0x44d   :  { %1393 = vrcp.f32 %v605_v12 }
 0x44e   :  { %v726_v29 = vpop.f32.mrb[20].mxu0  ;;  %1395 = vrcp.f32 %v617_v13 }
 0x44f   :  { %v1284_v30 = vpop.f32.mrb[21].mxu0  ;;  %v1388_v51 = vpop.eup %1387  ;;  %v1029_v54 = vmul.f32 %v1382_v48, %v726_v29 }
 0x450   :  { %v729_v23 = vpop.f32.mrb[22].mxu0 }
 0x451   :  { %v1285_v31 = vpop.f32.mrb[23].mxu0 }
 0x452   :  { %v774_v32 = vpop.f32.mrb[20].mxu1 }
 0x453   :  { %v1290_v33 = vpop.f32.mrb[21].mxu1  ;;  %v1030_v55 = vmul.f32 %v1384_v49, %v774_v32  ;;  %v1390_v0 = vpop.eup %1389 }
 0x454   :  { %v777_v34 = vpop.f32.mrb[22].mxu1  ;;  %v1392_v5 = vpop.eup %1391 }
 0x455   :  { %v1291_v25 = vpop.f32.mrb[23].mxu1 }
 0x456   :  { %v822_v35 = vpop.f32.mrb[24].mxu0 }
 0x457   :  { %v1296_v36 = vpop.f32.mrb[25].mxu0  ;;  %v1031_v4 = vmul.f32 %v1390_v0, %v822_v35  ;;  %v1394_v15 = vpop.eup %1393 }
 0x458   :  { %v825_v37 = vpop.f32.mrb[26].mxu0  ;;  %v1396_v19 = vpop.eup %1395  ;;  %v1028_v24 = vmul.f32 %v1394_v15, %v1738_v21  ;;  %v1176_v21 = vld [vmem:[%s1770_s4] ss:$0 sm:$0xff] }
 0x459   :  { %v1297_v38 = vpop.f32.mrb[27].mxu0 }
 0x483   :  { %v870_v43 = vpop.f32.mrb[24].mxu1 }
 0x484   :  { %v1302_v44 = vpop.f32.mrb[25].mxu1  ;;  %v1032_v20 = vmul.f32 %v1396_v19, %v870_v43 }
 0x485   :  { %v873_v26 = vpop.f32.mrb[26].mxu1 }
 0x486   :  { %v1303_v47 = vpop.f32.mrb[27].mxu1 }
 0x48b   :  { %v918_v52 = vpop.f32.mrb[28].mxu0  ;;  %v966_v53 = vpop.f32.mrb[28].mxu1 }
 0x48c   :  { %v1033_v56 = vmul.f32 %v1388_v51, %v918_v52  ;;  %v1034_v57 = vmul.f32 %v1386_v50, %v966_v53  ;;  %v1308_v58 = vpop.f32.mrb[29].mxu0  ;;  %v1314_v59 = vpop.f32.mrb[29].mxu1 }
 0x48d   :  { %v921_v61 = vpop.f32.mrb[30].mxu0  ;;  %v969_v62 = vpop.f32.mrb[30].mxu1 }
 0x48e   :  { %v1351_v63 = vpack.i.bf16 %v1034_v57, %v1030_v55  ;;  %v1309_v1 = vpop.f32.mrb[31].mxu0  ;;  %v1315_v2 = vpop.f32.mrb[31].mxu1  ;;  %v1346_v3 = vpack.i.bf16 %v1033_v56, %v1029_v54 }
 0x490   :  { %1352 = vrot.lane.b32.xlu0 %v1351_v63, %s1504_s2  ;;  %1347 = vrot.lane.b32.xlu1 %v1346_v3, %s1496_s17 }
 0x493   :  { %v1014_v6 = vpop.f32.mrb[32].mxu0 }
 0x494   :  { %v1035_v7 = vmul.f32 %v1392_v5, %v1014_v6  ;;  %v1320_v8 = vpop.f32.mrb[33].mxu0 }
 0x495   :  { %v1017_v9 = vpop.f32.mrb[34].mxu0 }
 0x496   :  { %v1356_v10 = vpack.i.bf16 %v1035_v7, %v1031_v4  ;;  %v1321_v11 = vpop.f32.mrb[35].mxu0 }
 0x498   :  { %1357 = vrot.lane.b32.xlu1 %v1356_v10, %s1505_s28 }
 0x502   :  { %v1348_v14 = vpop.permute.xlu1 %1347  ;;  %v1353_v16 = vpop.permute.xlu0 %1352 }
 0x503   :  { %v1350_v17 = vunpack.i.h.bf16 %v1348_v14  ;;  %v1349_v18 = vunpack.i.l.bf16 %v1348_v14  ;;  %v1355_v22 = vunpack.i.h.bf16 %v1353_v16  ;;  %v1354_v28 = vunpack.i.l.bf16 %v1353_v16 }
 0x505   :  { %v1061_v29 = vsel %vm165_vm2, %v1032_v20, %v1350_v17  ;;  %v1060_v30 = vsel %vm165_vm2, %v1028_v24, %v1349_v18 }
 0x506   :  { %v1063_v33 = vsel %vm1062_vm4, %v1060_v30, %v1354_v28  ;;  %v1064_v34 = vsel %vm1062_vm4, %v1061_v29, %v1355_v22 }
 0x50a   :  { %v1358_v23 = vpop.permute.xlu1 %1357 }
 0x50b   :  { %v1360_v31 = vunpack.i.h.bf16 %v1358_v23  ;;  %v1359_v32 = vunpack.i.l.bf16 %v1358_v23 }
 0x50d   :  { %v1067_v25 = vsel %vm1065_vm5, %v1064_v34, %v1360_v31  ;;  %v1066_v35 = vsel %vm1065_vm5, %v1063_v33, %v1359_v32 }
 0x50e   :  { %v1068_v36 = vpack.c.bf16 %v1067_v25, %v1066_v35 }
 0x510   :  { %1327 = vmatmul.mubr.msk.bf16.vlgmr.msra.gmra.mrb[32].mxu1 %vm89_vm1, %v1068_v36 }
 0x5e3   :  { %v1129_v37 = vpop.f32.mrb[32].mxu1 }
 0x5e4   :  { %v1130_v38 = vadd.f32 %v1176_v21, %v1129_v37  ;;  %v1328_v39 = vpop.f32.mrb[33].mxu1 }
 0x5e5   :  { %v1132_v40 = vpop.f32.mrb[34].mxu1 }
 0x5e6   :  { %1136 = vst.msk [vmem:[#allocation8] sm:$0xff] %vm89_vm1, %v1130_v38  ;;  %v1133_v41 = vadd.f32 %v1176_v21, %v1132_v40  ;;  %v1329_v42 = vpop.f32.mrb[35].mxu1 }
 0x5e8   :  { %1137 = vst.msk [vmem:[#allocation8 + $0x8] sm:$0xff] %vm89_vm1, %v1133_v41 }
 0x5e9   :  { %1474 = shalt.err (!%p1471_p0)
}
 0x5ea   :  { %s1475_s19 = scalar_lea.hbm %s1771_s5, 256 }
 0x5eb   :  { %p1476_p1 = scmp.ne.s32.totalorder %s1771_s5, %s1475_s19  ;;  %p1479_p2 = scmp.lt.u32.totalorder %s1475_s19, %s1771_s5 }
 0x5ed   :  { %p1481_p3 = pnand %p1479_p2, %p1476_p1 }
 0x5ef   :  { %1484 = shalt.err (!%p1481_p3)
}
 0x5f0   :  { %1149 = dma.vmem_to_hbm [thread:$0]  %s1144_s15, 256, %s1771_s5, [#allocation4], %s1495_s1, %s1495_s1, %s1496_s17  }
 0x5f1   :  { %1489 = dma.done.wait [#allocation4], 256  }
 0x5f2   :  { %1490 = vsyncadd [#allocation4], 4294967040 }
 0x5f3   :  { %1153 = vsyncpa [#allocation3], 1 }
 0x5f4   :  { %1154 = vsyncpa [#allocation6], 1 }
 0x5f5   :  { %1155 = vsyncpa [#allocation4], 1 }

</bundles_post_ra>
